<compile_context>
chip_gen: v7x
topology: tpu7x:2x2x1
jax: 0.10.0
libtpu: 0.0.40
codegen_flags: <defaults>
</compile_context>

<pallas_src>
import functools

import jax
import jax.numpy as jnp
from jax import lax
from jax.experimental import pallas as pl
from jax.experimental.pallas import tpu as pltpu

_SQRT1_2 = 0.7071067811865476


def _round_up(x, m):
    return ((x + m - 1) // m) * m


def _row_tile(m, max_tm=256):
    """Row tile that is a multiple of 8 and yields >=2 grid steps when possible."""
    return min(max_tm, _round_up(max(pl.cdiv(m, 2), 8), 8))


# ----------------------------------------------------------------------------
# Pallas kernels
# ----------------------------------------------------------------------------
def _linear_kernel(x_ref, w_ref, b_ref, o_ref):
    """y = x @ w + b for one row tile (patch embedding). w is bf16-resident."""
    x = x_ref[...].astype(jnp.bfloat16)
    o_ref[...] = jnp.dot(x, w_ref[...], preferred_element_type=jnp.float32) + b_ref[...]


def linear(x, w, b):
    """x: (M, K) f32, w: (K, N) bf16, b: (N,) f32 -> (M, N) f32. Row-tiled."""
    M, K = x.shape
    N = w.shape[1]
    tm = _row_tile(M)
    Mp = _round_up(M, tm)
    if Mp != M:
        x = jnp.pad(x, ((0, Mp - M), (0, 0)))
    # TODO(synk): for very large M*K also tile K with a VMEM f32 accumulator;
    # at vit_b_16 sizes (K<=3072) the full-K contraction fits comfortably.
    out = pl.pallas_call(
        _linear_kernel,
        grid=(Mp // tm,),
        in_specs=[
            pl.BlockSpec((tm, K), lambda i: (i, 0)),
            pl.BlockSpec((K, N), lambda i: (0, 0), pipeline_mode=pl.Buffered(1)),
            pl.BlockSpec((1, N), lambda i: (0, 0), pipeline_mode=pl.Buffered(1)),
        ],
        out_specs=pl.BlockSpec((tm, N), lambda i: (i, 0)),
        out_shape=jax.ShapeDtypeStruct((Mp, N), jnp.float32),
        compiler_params=pltpu.CompilerParams(
            dimension_semantics=("parallel",),
            vmem_limit_bytes=32 * 1024 * 1024),
    )(x, w, b.reshape(1, N))
    return out[:M]


def _attn_block_kernel(x_ref, g_ref, bln_ref, wqkv_ref, bqkv_ref, wo_ref, bo_ref,
                       o_ref, attn_ref, *, num_heads, scale, use_ln, add_residual, eps):
    """Fused [LN] -> QKV -> multi-head SDPA -> out-proj [-> +residual], one batch elem.

    attn_ref is a (S, E) f32 VMEM scratch that collects per-head outputs in place
    (no concatenate, bounded live ranges)."""
    x = x_ref[0]                                            # (S, E) f32
    E = x.shape[-1]
    Dh = E // num_heads

    if use_ln:
        mean = jnp.mean(x, axis=-1, keepdims=True)
        xc = x - mean
        var = jnp.mean(xc * xc, axis=-1, keepdims=True)
        h = xc * jax.lax.rsqrt(var + eps) * g_ref[...] + bln_ref[...]
    else:
        h = x

    # Single fused QKV projection (bf16 MXU operands, f32 accumulation).
    # This K=E contraction (and the out-proj / MLP ones) is the MXU workhorse;
    # the per-head K=Dh matmuls below are inherently shallow.
    qkv = jnp.dot(h.astype(jnp.bfloat16), wqkv_ref[...],
                  preferred_element_type=jnp.float32) + bqkv_ref[...]      # (S, 3E)

    for hd in range(num_heads):                             # static unroll over heads
        sl = slice(hd * Dh, (hd + 1) * Dh)
        qh = qkv[:, hd * Dh:(hd + 1) * Dh].astype(jnp.bfloat16)
        kh = qkv[:, E + hd * Dh:E + (hd + 1) * Dh].astype(jnp.bfloat16)
        vh = qkv[:, 2 * E + hd * Dh:2 * E + (hd + 1) * Dh].astype(jnp.bfloat16)
        # scores: contract on the last dims (no explicit transpose).
        s = lax.dot_general(qh, kh, (((1,), (1,)), ((), ())),
                            preferred_element_type=jnp.float32) * scale
        s = s - jnp.max(s, axis=-1, keepdims=True)
        p = jnp.exp(s)
        p = p * pl.reciprocal(jnp.sum(p, axis=-1, keepdims=True), approx=True)
        attn_ref[:, sl] = jnp.dot(p.astype(jnp.bfloat16), vh,
                                  preferred_element_type=jnp.float32)

    out = jnp.dot(attn_ref[...].astype(jnp.bfloat16), wo_ref[...],
                  preferred_element_type=jnp.float32) + bo_ref[...]
    if add_residual:
        out = out + x
    o_ref[0] = out


def attention_block(x, p, num_heads, *, use_ln, add_residual,
                    ln_g=None, ln_b=None, eps=1e-6):
    """x: (B, S, E). nn.MultiheadAttention(batch_first=True) semantics, eval mode."""
    B, S, E = x.shape
    Dh = E // num_heads
    scale = 1.0 / float(Dh) ** 0.5
    if ln_g is None:
        ln_g = jnp.ones((E,), jnp.float32)
        ln_b = jnp.zeros((E,), jnp.float32)
    kernel = functools.partial(
        _attn_block_kernel, num_heads=num_heads, scale=scale,
        use_ln=use_ln, add_residual=add_residual, eps=eps)
    # TODO(synk): at real vit_b_16 (S=197 / 2S=394) pad S to a multiple of 8
    # (ideally 256) with -inf key masking before softmax for cleaner vreg tiling
    # (matters most on v5e's single vector-store slot).
    return pl.pallas_call(
        kernel,
        grid=(B,),
        in_specs=[
            pl.BlockSpec((1, S, E), lambda i: (i, 0, 0)),
            pl.BlockSpec((1, E), lambda i: (0, 0)),
            pl.BlockSpec((1, E), lambda i: (0, 0)),
            pl.BlockSpec((E, 3 * E), lambda i: (0, 0), pipeline_mode=pl.Buffered(1)),
            pl.BlockSpec((1, 3 * E), lambda i: (0, 0)),
            pl.BlockSpec((E, E), lambda i: (0, 0), pipeline_mode=pl.Buffered(1)),
            pl.BlockSpec((1, E), lambda i: (0, 0)),
        ],
        out_specs=pl.BlockSpec((1, S, E), lambda i: (i, 0, 0)),
        out_shape=jax.ShapeDtypeStruct((B, S, E), jnp.float32),
        scratch_shapes=[pltpu.VMEM((S, E), jnp.float32)],
        compiler_params=pltpu.CompilerParams(
            dimension_semantics=("parallel",),
            vmem_limit_bytes=48 * 1024 * 1024),
    )(x, ln_g.reshape(1, E), ln_b.reshape(1, E),
      p["w_qkv"], p["b_qkv"].reshape(1, 3 * E),
      p["w_o"], p["b_o"].reshape(1, E))


def _ln_mlp_kernel(x_ref, g_ref, b_ref, w1_ref, b1_ref, w2_ref, b2_ref, o_ref, *, eps):
    """Fused LN -> W1 + GELU -> W2 -> +residual for one row tile."""
    x = x_ref[...]                                          # (tm, E) f32
    mean = jnp.mean(x, axis=-1, keepdims=True)
    xc = x - mean
    var = jnp.mean(xc * xc, axis=-1, keepdims=True)
    y = xc * jax.lax.rsqrt(var + eps) * g_ref[...] + b_ref[...]
    h = jnp.dot(y.astype(jnp.bfloat16), w1_ref[...],
                preferred_element_type=jnp.float32) + b1_ref[...]
    h = 0.5 * h * (1.0 + jax.lax.erf(h * _SQRT1_2))         # exact GELU, f32
    out = jnp.dot(h.astype(jnp.bfloat16), w2_ref[...],
                  preferred_element_type=jnp.float32) + b2_ref[...]
    o_ref[...] = x + out


def ln_mlp(x, g, b, w1, b1, w2, b2, eps=1e-6):
    """x: (M, E) f32 -> (M, E) f32, fused LN+MLP+residual, row-tiled over M."""
    M, E = x.shape
    F = w1.shape[1]
    tm = _row_tile(M)
    Mp = _round_up(M, tm)
    if Mp != M:
        x = jnp.pad(x, ((0, Mp - M), (0, 0)))               # padded rows sliced off below
    kernel = functools.partial(_ln_mlp_kernel, eps=eps)
    out = pl.pallas_call(
        kernel,
        grid=(Mp // tm,),
        in_specs=[
            pl.BlockSpec((tm, E), lambda i: (i, 0)),
            pl.BlockSpec((1, E), lambda i: (0, 0)),
            pl.BlockSpec((1, E), lambda i: (0, 0)),
            pl.BlockSpec((E, F), lambda i: (0, 0), pipeline_mode=pl.Buffered(1)),
            pl.BlockSpec((1, F), lambda i: (0, 0)),
            pl.BlockSpec((F, E), lambda i: (0, 0), pipeline_mode=pl.Buffered(1)),
            pl.BlockSpec((1, E), lambda i: (0, 0)),
        ],
        out_specs=pl.BlockSpec((tm, E), lambda i: (i, 0)),
        out_shape=jax.ShapeDtypeStruct((Mp, E), jnp.float32),
        compiler_params=pltpu.CompilerParams(
            dimension_semantics=("parallel",),
            vmem_limit_bytes=32 * 1024 * 1024),
    )(x, g.reshape(1, E), b.reshape(1, E), w1, b1.reshape(1, F), w2, b2.reshape(1, E))
    return out[:M]


# ----------------------------------------------------------------------------
# Model building blocks (glue + Pallas calls)
# ----------------------------------------------------------------------------
def encoder_block(x, p, num_heads):
    """torchvision ViT EncoderBlock (pre-LN); dropout = identity (eval)."""
    B, S, E = x.shape
    # LN1 -> MHA -> +residual, fully fused per batch element.
    x = attention_block(x, p["attn"], num_heads, use_ln=True, add_residual=True,
                        ln_g=p["ln1_g"], ln_b=p["ln1_b"], eps=1e-6)
    # LN2 -> MLP -> +residual, fused and row-tiled over all rows.
    x = ln_mlp(x.reshape(B * S, E), p["ln2_g"], p["ln2_b"],
               p["mlp_w1"], p["mlp_b1"], p["mlp_w2"], p["mlp_b2"],
               eps=1e-6).reshape(B, S, E)
    return x


def vit_encode(img, p, *, num_heads, patch):
    """Returns output of the LAST encoder block (== PyTorch forward hook)."""
    B, C, H, W = img.shape
    P = patch
    nh, nw = H // P, W // P
    # conv_proj (kernel=P, stride=P) as patch-flatten + matmul; flatten order
    # matches PyTorch conv weight layout (c, ph, pw).
    patches = (
        img.reshape(B, C, nh, P, nw, P)
        .transpose(0, 2, 4, 1, 3, 5)
        .reshape(B * nh * nw, C * P * P)
    )
    x = linear(patches, p["w_patch"], p["b_patch"]).reshape(B, nh * nw, -1)
    E = x.shape[-1]
    cls = jnp.broadcast_to(p["class_token"], (B, 1, E))
    x = jnp.concatenate([cls, x], axis=1) + p["pos_embedding"]
    # TODO(synk): cross-pallas_call prefetch of layer l+1 weights (semaphore
    # "future" pattern) would hide the per-layer weight DMA behind compute.
    for lp in p["layers"]:
        x = encoder_block(x, lp, num_heads)
    return x  # pre final-LayerNorm, exactly what the hook captures


def wdisi_forward(fg, bg, params, *, num_heads, patch):
    B = fg.shape[0]
    # fg and bg share the ViT weights -> run them as one batched encoder pass.
    imgs = jnp.concatenate([fg, bg], axis=0)                        # (2B, C, H, W)
    emb = vit_encode(imgs, params["vit"], num_heads=num_heads, patch=patch)
    fg_emb, bg_emb = emb[:B], emb[B:]
    joint_emb = jnp.concatenate([fg_emb, bg_emb], axis=1)           # (B, 2S, E)
    final_emb = attention_block(joint_emb, params["joint_attn"], num_heads,
                                use_ln=False, add_residual=False)
    return final_emb.reshape(B, -1)                                 # flatten(start_dim=1)


# ----------------------------------------------------------------------------
# Deterministic synthetic parameters (big projection weights stored in bf16)
# ----------------------------------------------------------------------------
def _mha_params(key, hidden):
    ks = jax.random.split(key, 2)
    s = 0.02
    return {
        # fused QKV projection: columns packed [q | k | v], bf16-resident.
        "w_qkv": (jax.random.normal(ks[0], (hidden, 3 * hidden), jnp.float32) * s
                  ).astype(jnp.bfloat16),
        "b_qkv": jnp.zeros((3 * hidden,), jnp.float32),
        "w_o": (jax.random.normal(ks[1], (hidden, hidden), jnp.float32) * s
                ).astype(jnp.bfloat16),
        "b_o": jnp.zeros((hidden,), jnp.float32),
    }


def init_params(key, *, img_size, patch, hidden, mlp_dim, num_layers, in_ch=3):
    nh = img_size // patch
    seq = nh * nh + 1
    keys = jax.random.split(key, 4 + num_layers)
    s = 0.02
    layers = []
    for l in range(num_layers):
        lk = jax.random.split(keys[4 + l], 3)
        layers.append(
            {
                "ln1_g": jnp.ones((hidden,), jnp.float32),
                "ln1_b": jnp.zeros((hidden,), jnp.float32),
                "attn": _mha_params(lk[0], hidden),
                "ln2_g": jnp.ones((hidden,), jnp.float32),
                "ln2_b": jnp.zeros((hidden,), jnp.float32),
                "mlp_w1": (jax.random.normal(lk[1], (hidden, mlp_dim), jnp.float32) * s
                           ).astype(jnp.bfloat16),
                "mlp_b1": jnp.zeros((mlp_dim,), jnp.float32),
                "mlp_w2": (jax.random.normal(lk[2], (mlp_dim, hidden), jnp.float32) * s
                           ).astype(jnp.bfloat16),
                "mlp_b2": jnp.zeros((hidden,), jnp.float32),
            }
        )
    vit = {
        # TODO(synk): on v7x the projection weights could be fp8 + per-channel
        # scales for another 2x on weight DMA if accuracy budget allows.
        "w_patch": (jax.random.normal(keys[0], (in_ch * patch * patch, hidden),
                                      jnp.float32) * s).astype(jnp.bfloat16),
        "b_patch": jnp.zeros((hidden,), jnp.float32),
        "class_token": jax.random.normal(keys[1], (1, 1, hidden), jnp.float32) * s,
        "pos_embedding": jax.random.normal(keys[2], (1, seq, hidden), jnp.float32) * s,
        "layers": layers,
    }
    return {"vit": vit, "joint_attn": _mha_params(keys[3], hidden)}


# ----------------------------------------------------------------------------
# Main
# ----------------------------------------------------------------------------
if __name__ == "__main__":
    # Small shapes consistent with the module (patch 16, class token, etc.)
    B, C, IMG = 2, 3, 32          # img_size=32 -> 2x2 patches -> seq 5 per image
    PATCH = 16                    # static (not part of the traced params pytree)
    HIDDEN = 32                   # stand-in for 768 (vit_b_16 hidden_dim)
    NUM_HEADS = 4
    MLP_DIM = 64
    NUM_LAYERS = 2
    # TODO(synk): pretrained IMAGENET1K_V1 weights cannot be loaded; synthetic init.

    key = jax.random.PRNGKey(0)
    k_fg, k_bg, k_p = jax.random.split(key, 3)
    fg = jax.random.normal(k_fg, (B, C, IMG, IMG), jnp.float32)
    bg = jax.random.normal(k_bg, (B, C, IMG, IMG), jnp.float32)
    params = init_params(
        k_p, img_size=IMG, patch=PATCH, hidden=HIDDEN,
        mlp_dim=MLP_DIM, num_layers=NUM_LAYERS, in_ch=C,
    )

    fwd = jax.jit(functools.partial(wdisi_forward, num_heads=NUM_HEADS, patch=PATCH))
    out = fwd(fg, bg, params)
    jax.block_until_ready(out)

    # feat_dim = 2 * (N**2 + 1) * hidden with N = img_size // 16
    N = IMG // 16
    expected = (B, 2 * (N ** 2 + 1) * HIDDEN)
    assert out.shape == expected, (out.shape, expected)
    assert bool(jnp.all(jnp.isfinite(out)))
    print("KERNEL_OK")
</pallas_src>

<mosaic_0001>
module attributes {stable_mosaic.version = 11 : i64} {
  func.func @_linear_kernel(%arg0: i32, %arg1: memref<8x768xf32, #tpu.memory_space<vmem>>, %arg2: memref<768x32xbf16, #tpu.memory_space<vmem>>, %arg3: memref<1x32xf32, #tpu.memory_space<vmem>>, %arg4: memref<8x32xf32, #tpu.memory_space<vmem>>) attributes {dimension_semantics = [#tpu.dimension_semantics<parallel>], iteration_bounds = array<i64: 2>, scalar_prefetch = 0 : i64, scratch_operands = 0 : i64, tpu.core_type = #tpu.core_type<tc>, window_params = [{transform_indices = @transform_0, window_bounds = array<i64: 8, 768>}, {pipeline_mode = #tpu.pipeline_mode<synchronous>, transform_indices = @transform_1, window_bounds = array<i64: 768, 32>}, {pipeline_mode = #tpu.pipeline_mode<synchronous>, transform_indices = @transform_2, window_bounds = array<i64: 1, 32>}, {transform_indices = @transform_3, window_bounds = array<i64: 8, 32>}]} {
    %c0 = arith.constant 0 : index
    %c0_0 = arith.constant 0 : index
    %0 = vector.load %arg1[%c0, %c0_0] : memref<8x768xf32, #tpu.memory_space<vmem>>, vector<8x768xf32>
    %1 = arith.truncf %0 : vector<8x768xf32> to vector<8x768xbf16>
    %c0_1 = arith.constant 0 : index
    %c0_2 = arith.constant 0 : index
    %2 = vector.load %arg2[%c0_1, %c0_2] : memref<768x32xbf16, #tpu.memory_space<vmem>>, vector<768x32xbf16>
    %cst = arith.constant dense<0.000000e+00> : vector<8x32xf32>
    %3 = tpu.matmul %1, %2, %cst {dimension_numbers = #tpu.dot_dimension_numbers<[1], [0], [0], [1], [0, 0, 1, 1], [], []>} : vector<8x768xbf16>, vector<768x32xbf16>, vector<8x32xf32> -> vector<8x32xf32>
    %c0_3 = arith.constant 0 : index
    %c0_4 = arith.constant 0 : index
    %4 = vector.load %arg3[%c0_3, %c0_4] : memref<1x32xf32, #tpu.memory_space<vmem>>, vector<1x32xf32>
    %5 = vector.broadcast %4 : vector<1x32xf32> to vector<8x32xf32>
    %6 = arith.addf %3, %5 : vector<8x32xf32>
    %c0_5 = arith.constant 0 : index
    %c0_6 = arith.constant 0 : index
    %7 = vector.load %arg4[%c0_5, %c0_6] : memref<8x32xf32, #tpu.memory_space<vmem>>, vector<8x32xf32>
    tpu.vector_store %arg4[%c0_5, %c0_6], %6 {strides = array<i32>} : memref<8x32xf32, #tpu.memory_space<vmem>>, vector<8x32xf32>,
    return
  }
  func.func @transform_0(%arg0: i32) -> (i32, i32) {
    %c0_i32 = arith.constant 0 : i32
    %c0_i32_0 = arith.constant 0 : i32
    return %arg0, %c0_i32 : i32, i32
  }
  func.func @transform_1(%arg0: i32) -> (i32, i32) {
    %c0_i32 = arith.constant 0 : i32
    %c0_i32_0 = arith.constant 0 : i32
    %c0_i32_1 = arith.constant 0 : i32
    return %c0_i32, %c0_i32_0 : i32, i32
  }
  func.func @transform_2(%arg0: i32) -> (i32, i32) {
    %c0_i32 = arith.constant 0 : i32
    %c0_i32_0 = arith.constant 0 : i32
    %c0_i32_1 = arith.constant 0 : i32
    return %c0_i32, %c0_i32_0 : i32, i32
  }
  func.func @transform_3(%arg0: i32) -> (i32, i32) {
    %c0_i32 = arith.constant 0 : i32
    %c0_i32_0 = arith.constant 0 : i32
    return %arg0, %c0_i32 : i32, i32
  }
}

module attributes {stable_mosaic.version = 11 : i64} {
  func.func @_attn_block_kernel(%arg0: i32, %arg1: memref<1x5x32xf32, #tpu.memory_space<vmem>>, %arg2: memref<1x32xf32, #tpu.memory_space<vmem>>, %arg3: memref<1x32xf32, #tpu.memory_space<vmem>>, %arg4: memref<32x96xbf16, #tpu.memory_space<vmem>>, %arg5: memref<1x96xf32, #tpu.memory_space<vmem>>, %arg6: memref<32x32xbf16, #tpu.memory_space<vmem>>, %arg7: memref<1x32xf32, #tpu.memory_space<vmem>>, %arg8: memref<1x5x32xf32, #tpu.memory_space<vmem>>, %arg9: memref<5x32xf32, #tpu.memory_space<vmem>>) attributes {dimension_semantics = [#tpu.dimension_semantics<parallel>], iteration_bounds = array<i64: 4>, scalar_prefetch = 0 : i64, scratch_operands = 1 : i64, tpu.core_type = #tpu.core_type<tc>, window_params = [{transform_indices = @transform_0, window_bounds = array<i64: 1, 5, 32>}, {pipeline_mode = #tpu.pipeline_mode<synchronous>, transform_indices = @transform_1, window_bounds = array<i64: 1, 32>}, {pipeline_mode = #tpu.pipeline_mode<synchronous>, transform_indices = @transform_2, window_bounds = array<i64: 1, 32>}, {pipeline_mode = #tpu.pipeline_mode<synchronous>, transform_indices = @transform_3, window_bounds = array<i64: 32, 96>}, {pipeline_mode = #tpu.pipeline_mode<synchronous>, transform_indices = @transform_4, window_bounds = array<i64: 1, 96>}, {pipeline_mode = #tpu.pipeline_mode<synchronous>, transform_indices = @transform_5, window_bounds = array<i64: 32, 32>}, {pipeline_mode = #tpu.pipeline_mode<synchronous>, transform_indices = @transform_6, window_bounds = array<i64: 1, 32>}, {transform_indices = @transform_7, window_bounds = array<i64: 1, 5, 32>}]} {
    %c0 = arith.constant 0 : index
    %c0_0 = arith.constant 0 : index
    %c0_1 = arith.constant 0 : index
    %0 = vector.load %arg1[%c0, %c0_0, %c0_1] : memref<1x5x32xf32, #tpu.memory_space<vmem>>, vector<1x5x32xf32>
    %1 = vector.shape_cast %0 : vector<1x5x32xf32> to vector<5x32xf32>
    %cst = arith.constant dense<0.000000e+00> : vector<5xf32>
    %2 = vector.multi_reduction <add>, %1, %cst [1] : vector<5x32xf32> to vector<5xf32>
    %3 = vector.shape_cast %2 : vector<5xf32> to vector<5x1xf32>
    %cst_2 = arith.constant 3.200000e+01 : f32
    %4 = vector.broadcast %cst_2 : f32 to vector<5x1xf32>
    %5 = arith.divf %3, %4 : vector<5x1xf32>
    %6 = vector.broadcast %5 : vector<5x1xf32> to vector<5x32xf32>
    %7 = arith.subf %1, %6 : vector<5x32xf32>
    %8 = arith.mulf %7, %7 : vector<5x32xf32>
    %cst_3 = arith.constant dense<0.000000e+00> : vector<5xf32>
    %9 = vector.multi_reduction <add>, %8, %cst_3 [1] : vector<5x32xf32> to vector<5xf32>
    %10 = vector.shape_cast %9 : vector<5xf32> to vector<5x1xf32>
    %cst_4 = arith.constant 3.200000e+01 : f32
    %11 = vector.broadcast %cst_4 : f32 to vector<5x1xf32>
    %12 = arith.divf %10, %11 : vector<5x1xf32>
    %cst_5 = arith.constant 9.99999997E-7 : f32
    %13 = vector.broadcast %cst_5 : f32 to vector<5x1xf32>
    %14 = arith.addf %12, %13 : vector<5x1xf32>
    %15 = math.rsqrt %14 : vector<5x1xf32>
    %16 = vector.broadcast %15 : vector<5x1xf32> to vector<5x32xf32>
    %17 = arith.mulf %7, %16 : vector<5x32xf32>
    %c0_6 = arith.constant 0 : index
    %c0_7 = arith.constant 0 : index
    %18 = vector.load %arg2[%c0_6, %c0_7] : memref<1x32xf32, #tpu.memory_space<vmem>>, vector<1x32xf32>
    %19 = vector.broadcast %18 : vector<1x32xf32> to vector<5x32xf32>
    %20 = arith.mulf %17, %19 : vector<5x32xf32>
    %c0_8 = arith.constant 0 : index
    %c0_9 = arith.constant 0 : index
    %21 = vector.load %arg3[%c0_8, %c0_9] : memref<1x32xf32, #tpu.memory_space<vmem>>, vector<1x32xf32>
    %22 = vector.broadcast %21 : vector<1x32xf32> to vector<5x32xf32>
    %23 = arith.addf %20, %22 : vector<5x32xf32>
    %24 = arith.truncf %23 : vector<5x32xf32> to vector<5x32xbf16>
    %c0_10 = arith.constant 0 : index
    %c0_11 = arith.constant 0 : index
    %25 = vector.load %arg4[%c0_10, %c0_11] : memref<32x96xbf16, #tpu.memory_space<vmem>>, vector<32x96xbf16>
    %cst_12 = arith.constant dense<0.000000e+00> : vector<5x96xf32>
    %26 = tpu.matmul %24, %25, %cst_12 {dimension_numbers = #tpu.dot_dimension_numbers<[1], [0], [0], [1], [0, 0, 1, 1], [], []>} : vector<5x32xbf16>, vector<32x96xbf16>, vector<5x96xf32> -> vector<5x96xf32>
    %c0_13 = arith.constant 0 : index
    %c0_14 = arith.constant 0 : index
    %27 = vector.load %arg5[%c0_13, %c0_14] : memref<1x96xf32, #tpu.memory_space<vmem>>, vector<1x96xf32>
    %28 = vector.broadcast %27 : vector<1x96xf32> to vector<5x96xf32>
    %29 = arith.addf %26, %28 : vector<5x96xf32>
    %30 = vector.extract_strided_slice %29 {offsets = [0, 0], sizes = [5, 8], strides = [1, 1]} : vector<5x96xf32> to vector<5x8xf32>
    %31 = arith.truncf %30 : vector<5x8xf32> to vector<5x8xbf16>
    %32 = vector.extract_strided_slice %29 {offsets = [0, 32], sizes = [5, 8], strides = [1, 1]} : vector<5x96xf32> to vector<5x8xf32>
    %33 = arith.truncf %32 : vector<5x8xf32> to vector<5x8xbf16>
    %34 = vector.extract_strided_slice %29 {offsets = [0, 64], sizes = [5, 8], strides = [1, 1]} : vector<5x96xf32> to vector<5x8xf32>
    %35 = arith.truncf %34 : vector<5x8xf32> to vector<5x8xbf16>
    %cst_15 = arith.constant dense<0.000000e+00> : vector<5x5xf32>
    %36 = tpu.matmul %31, %33, %cst_15 {dimension_numbers = #tpu.dot_dimension_numbers<[1], [1], [0], [0], [0, 0, 1, 0], [], []>} : vector<5x8xbf16>, vector<5x8xbf16>, vector<5x5xf32> -> vector<5x5xf32>
    %cst_16 = arith.constant 0.353553385 : f32
    %37 = vector.broadcast %cst_16 : f32 to vector<5x5xf32>
    %38 = arith.mulf %36, %37 : vector<5x5xf32>
    %cst_17 = arith.constant dense<0xFF800000> : vector<5xf32>
    %39 = vector.multi_reduction <maximumf>, %38, %cst_17 [1] : vector<5x5xf32> to vector<5xf32>
    %40 = vector.shape_cast %39 : vector<5xf32> to vector<5x1xf32>
    %41 = vector.broadcast %40 : vector<5x1xf32> to vector<5x5xf32>
    %42 = arith.subf %38, %41 : vector<5x5xf32>
    %43 = math.exp %42 : vector<5x5xf32>
    %cst_18 = arith.constant dense<0.000000e+00> : vector<5xf32>
    %44 = vector.multi_reduction <add>, %43, %cst_18 [1] : vector<5x5xf32> to vector<5xf32>
    %45 = vector.shape_cast %44 : vector<5xf32> to vector<5x1xf32>
    %46 = tpu.reciprocal %45 {approx = true} : vector<5x1xf32> -> vector<5x1xf32>
    %47 = vector.broadcast %46 : vector<5x1xf32> to vector<5x5xf32>
    %48 = arith.mulf %43, %47 : vector<5x5xf32>
    %49 = arith.truncf %48 : vector<5x5xf32> to vector<5x5xbf16>
    %cst_19 = arith.constant dense<0.000000e+00> : vector<5x8xf32>
    %50 = tpu.matmul %49, %35, %cst_19 {dimension_numbers = #tpu.dot_dimension_numbers<[1], [0], [0], [1], [0, 0, 1, 1], [], []>} : vector<5x5xbf16>, vector<5x8xbf16>, vector<5x8xf32> -> vector<5x8xf32>
    %c0_20 = arith.constant 0 : index
    %c0_21 = arith.constant 0 : index
    %51 = vector.load %arg9[%c0_20, %c0_21] : memref<5x32xf32, #tpu.memory_space<vmem>>, vector<5x8xf32>
    tpu.vector_store %arg9[%c0_20, %c0_21], %50 {strides = array<i32>} : memref<5x32xf32, #tpu.memory_space<vmem>>, vector<5x8xf32>,
    %52 = vector.extract_strided_slice %29 {offsets = [0, 8], sizes = [5, 8], strides = [1, 1]} : vector<5x96xf32> to vector<5x8xf32>
    %53 = arith.truncf %52 : vector<5x8xf32> to vector<5x8xbf16>
    %54 = vector.extract_strided_slice %29 {offsets = [0, 40], sizes = [5, 8], strides = [1, 1]} : vector<5x96xf32> to vector<5x8xf32>
    %55 = arith.truncf %54 : vector<5x8xf32> to vector<5x8xbf16>
    %56 = vector.extract_strided_slice %29 {offsets = [0, 72], sizes = [5, 8], strides = [1, 1]} : vector<5x96xf32> to vector<5x8xf32>
    %57 = arith.truncf %56 : vector<5x8xf32> to vector<5x8xbf16>
    %cst_22 = arith.constant dense<0.000000e+00> : vector<5x5xf32>
    %58 = tpu.matmul %53, %55, %cst_22 {dimension_numbers = #tpu.dot_dimension_numbers<[1], [1], [0], [0], [0, 0, 1, 0], [], []>} : vector<5x8xbf16>, vector<5x8xbf16>, vector<5x5xf32> -> vector<5x5xf32>
    %cst_23 = arith.constant 0.353553385 : f32
    %59 = vector.broadcast %cst_23 : f32 to vector<5x5xf32>
    %60 = arith.mulf %58, %59 : vector<5x5xf32>
    %cst_24 = arith.constant dense<0xFF800000> : vector<5xf32>
    %61 = vector.multi_reduction <maximumf>, %60, %cst_24 [1] : vector<5x5xf32> to vector<5xf32>
    %62 = vector.shape_cast %61 : vector<5xf32> to vector<5x1xf32>
    %63 = vector.broadcast %62 : vector<5x1xf32> to vector<5x5xf32>
    %64 = arith.subf %60, %63 : vector<5x5xf32>
    %65 = math.exp %64 : vector<5x5xf32>
    %cst_25 = arith.constant dense<0.000000e+00> : vector<5xf32>
    %66 = vector.multi_reduction <add>, %65, %cst_25 [1] : vector<5x5xf32> to vector<5xf32>
    %67 = vector.shape_cast %66 : vector<5xf32> to vector<5x1xf32>
    %68 = tpu.reciprocal %67 {approx = true} : vector<5x1xf32> -> vector<5x1xf32>
    %69 = vector.broadcast %68 : vector<5x1xf32> to vector<5x5xf32>
    %70 = arith.mulf %65, %69 : vector<5x5xf32>
    %71 = arith.truncf %70 : vector<5x5xf32> to vector<5x5xbf16>
    %cst_26 = arith.constant dense<0.000000e+00> : vector<5x8xf32>
    %72 = tpu.matmul %71, %57, %cst_26 {dimension_numbers = #tpu.dot_dimension_numbers<[1], [0], [0], [1], [0, 0, 1, 1], [], []>} : vector<5x5xbf16>, vector<5x8xbf16>, vector<5x8xf32> -> vector<5x8xf32>
    %c0_27 = arith.constant 0 : index
    %c8 = arith.constant 8 : index
    %73 = vector.load %arg9[%c0_27, %c8] : memref<5x32xf32, #tpu.memory_space<vmem>>, vector<5x8xf32>
    tpu.vector_store %arg9[%c0_27, %c8], %72 {strides = array<i32>} : memref<5x32xf32, #tpu.memory_space<vmem>>, vector<5x8xf32>,
    %74 = vector.extract_strided_slice %29 {offsets = [0, 16], sizes = [5, 8], strides = [1, 1]} : vector<5x96xf32> to vector<5x8xf32>
    %75 = arith.truncf %74 : vector<5x8xf32> to vector<5x8xbf16>
    %76 = vector.extract_strided_slice %29 {offsets = [0, 48], sizes = [5, 8], strides = [1, 1]} : vector<5x96xf32> to vector<5x8xf32>
    %77 = arith.truncf %76 : vector<5x8xf32> to vector<5x8xbf16>
    %78 = vector.extract_strided_slice %29 {offsets = [0, 80], sizes = [5, 8], strides = [1, 1]} : vector<5x96xf32> to vector<5x8xf32>
    %79 = arith.truncf %78 : vector<5x8xf32> to vector<5x8xbf16>
    %cst_28 = arith.constant dense<0.000000e+00> : vector<5x5xf32>
    %80 = tpu.matmul %75, %77, %cst_28 {dimension_numbers = #tpu.dot_dimension_numbers<[1], [1], [0], [0], [0, 0, 1, 0], [], []>} : vector<5x8xbf16>, vector<5x8xbf16>, vector<5x5xf32> -> vector<5x5xf32>
    %cst_29 = arith.constant 0.353553385 : f32
    %81 = vector.broadcast %cst_29 : f32 to vector<5x5xf32>
    %82 = arith.mulf %80, %81 : vector<5x5xf32>
    %cst_30 = arith.constant dense<0xFF800000> : vector<5xf32>
    %83 = vector.multi_reduction <maximumf>, %82, %cst_30 [1] : vector<5x5xf32> to vector<5xf32>
    %84 = vector.shape_cast %83 : vector<5xf32> to vector<5x1xf32>
    %85 = vector.broadcast %84 : vector<5x1xf32> to vector<5x5xf32>
    %86 = arith.subf %82, %85 : vector<5x5xf32>
    %87 = math.exp %86 : vector<5x5xf32>
    %cst_31 = arith.constant dense<0.000000e+00> : vector<5xf32>
    %88 = vector.multi_reduction <add>, %87, %cst_31 [1] : vector<5x5xf32> to vector<5xf32>
    %89 = vector.shape_cast %88 : vector<5xf32> to vector<5x1xf32>
    %90 = tpu.reciprocal %89 {approx = true} : vector<5x1xf32> -> vector<5x1xf32>
    %91 = vector.broadcast %90 : vector<5x1xf32> to vector<5x5xf32>
    %92 = arith.mulf %87, %91 : vector<5x5xf32>
    %93 = arith.truncf %92 : vector<5x5xf32> to vector<5x5xbf16>
    %cst_32 = arith.constant dense<0.000000e+00> : vector<5x8xf32>
    %94 = tpu.matmul %93, %79, %cst_32 {dimension_numbers = #tpu.dot_dimension_numbers<[1], [0], [0], [1], [0, 0, 1, 1], [], []>} : vector<5x5xbf16>, vector<5x8xbf16>, vector<5x8xf32> -> vector<5x8xf32>
    %c0_33 = arith.constant 0 : index
    %c16 = arith.constant 16 : index
    %95 = vector.load %arg9[%c0_33, %c16] : memref<5x32xf32, #tpu.memory_space<vmem>>, vector<5x8xf32>
    tpu.vector_store %arg9[%c0_33, %c16], %94 {strides = array<i32>} : memref<5x32xf32, #tpu.memory_space<vmem>>, vector<5x8xf32>,
    %96 = vector.extract_strided_slice %29 {offsets = [0, 24], sizes = [5, 8], strides = [1, 1]} : vector<5x96xf32> to vector<5x8xf32>
    %97 = arith.truncf %96 : vector<5x8xf32> to vector<5x8xbf16>
    %98 = vector.extract_strided_slice %29 {offsets = [0, 56], sizes = [5, 8], strides = [1, 1]} : vector<5x96xf32> to vector<5x8xf32>
    %99 = arith.truncf %98 : vector<5x8xf32> to vector<5x8xbf16>
    %100 = vector.extract_strided_slice %29 {offsets = [0, 88], sizes = [5, 8], strides = [1, 1]} : vector<5x96xf32> to vector<5x8xf32>
    %101 = arith.truncf %100 : vector<5x8xf32> to vector<5x8xbf16>
    %cst_34 = arith.constant dense<0.000000e+00> : vector<5x5xf32>
    %102 = tpu.matmul %97, %99, %cst_34 {dimension_numbers = #tpu.dot_dimension_numbers<[1], [1], [0], [0], [0, 0, 1, 0], [], []>} : vector<5x8xbf16>, vector<5x8xbf16>, vector<5x5xf32> -> vector<5x5xf32>
    %cst_35 = arith.constant 0.353553385 : f32
    %103 = vector.broadcast %cst_35 : f32 to vector<5x5xf32>
    %104 = arith.mulf %102, %103 : vector<5x5xf32>
    %cst_36 = arith.constant dense<0xFF800000> : vector<5xf32>
    %105 = vector.multi_reduction <maximumf>, %104, %cst_36 [1] : vector<5x5xf32> to vector<5xf32>
    %106 = vector.shape_cast %105 : vector<5xf32> to vector<5x1xf32>
    %107 = vector.broadcast %106 : vector<5x1xf32> to vector<5x5xf32>
    %108 = arith.subf %104, %107 : vector<5x5xf32>
    %109 = math.exp %108 : vector<5x5xf32>
    %cst_37 = arith.constant dense<0.000000e+00> : vector<5xf32>
    %110 = vector.multi_reduction <add>, %109, %cst_37 [1] : vector<5x5xf32> to vector<5xf32>
    %111 = vector.shape_cast %110 : vector<5xf32> to vector<5x1xf32>
    %112 = tpu.reciprocal %111 {approx = true} : vector<5x1xf32> -> vector<5x1xf32>
    %113 = vector.broadcast %112 : vector<5x1xf32> to vector<5x5xf32>
    %114 = arith.mulf %109, %113 : vector<5x5xf32>
    %115 = arith.truncf %114 : vector<5x5xf32> to vector<5x5xbf16>
    %cst_38 = arith.constant dense<0.000000e+00> : vector<5x8xf32>
    %116 = tpu.matmul %115, %101, %cst_38 {dimension_numbers = #tpu.dot_dimension_numbers<[1], [0], [0], [1], [0, 0, 1, 1], [], []>} : vector<5x5xbf16>, vector<5x8xbf16>, vector<5x8xf32> -> vector<5x8xf32>
    %c0_39 = arith.constant 0 : index
    %c24 = arith.constant 24 : index
    %117 = vector.load %arg9[%c0_39, %c24] : memref<5x32xf32, #tpu.memory_space<vmem>>, vector<5x8xf32>
    tpu.vector_store %arg9[%c0_39, %c24], %116 {strides = array<i32>} : memref<5x32xf32, #tpu.memory_space<vmem>>, vector<5x8xf32>,
    %c0_40 = arith.constant 0 : index
    %c0_41 = arith.constant 0 : index
    %118 = vector.load %arg9[%c0_40, %c0_41] : memref<5x32xf32, #tpu.memory_space<vmem>>, vector<5x32xf32>
    %119 = arith.truncf %118 : vector<5x32xf32> to vector<5x32xbf16>
    %c0_42 = arith.constant 0 : index
    %c0_43 = arith.constant 0 : index
    %120 = vector.load %arg6[%c0_42, %c0_43] : memref<32x32xbf16, #tpu.memory_space<vmem>>, vector<32x32xbf16>
    %cst_44 = arith.constant dense<0.000000e+00> : vector<5x32xf32>
    %121 = tpu.matmul %119, %120, %cst_44 {dimension_numbers = #tpu.dot_dimension_numbers<[1], [0], [0], [1], [0, 0, 1, 1], [], []>} : vector<5x32xbf16>, vector<32x32xbf16>, vector<5x32xf32> -> vector<5x32xf32>
    %c0_45 = arith.constant 0 : index
    %c0_46 = arith.constant 0 : index
    %122 = vector.load %arg7[%c0_45, %c0_46] : memref<1x32xf32, #tpu.memory_space<vmem>>, vector<1x32xf32>
    %123 = vector.broadcast %122 : vector<1x32xf32> to vector<5x32xf32>
    %124 = arith.addf %121, %123 : vector<5x32xf32>
    %125 = arith.addf %124, %1 : vector<5x32xf32>
    %c0_47 = arith.constant 0 : index
    %c0_48 = arith.constant 0 : index
    %c0_49 = arith.constant 0 : index
    %126 = vector.load %arg8[%c0_47, %c0_48, %c0_49] : memref<1x5x32xf32, #tpu.memory_space<vmem>>, vector<1x5x32xf32>
    %127 = vector.shape_cast %126 : vector<1x5x32xf32> to vector<5x32xf32>
    %128 = vector.shape_cast %125 : vector<5x32xf32> to vector<1x5x32xf32>
    tpu.vector_store %arg8[%c0_47, %c0_48, %c0_49], %128 {strides = array<i32>} : memref<1x5x32xf32, #tpu.memory_space<vmem>>, vector<1x5x32xf32>,
    return
  }
  func.func @transform_0(%arg0: i32) -> (i32, i32, i32) {
    %c0_i32 = arith.constant 0 : i32
    %c0_i32_0 = arith.constant 0 : i32
    %c0_i32_1 = arith.constant 0 : i32
    return %arg0, %c0_i32, %c0_i32_0 : i32, i32, i32
  }
  func.func @transform_1(%arg0: i32) -> (i32, i32) {
    %c0_i32 = arith.constant 0 : i32
    %c0_i32_0 = arith.constant 0 : i32
    %c0_i32_1 = arith.constant 0 : i32
    return %c0_i32, %c0_i32_0 : i32, i32
  }
  func.func @transform_2(%arg0: i32) -> (i32, i32) {
    %c0_i32 = arith.constant 0 : i32
    %c0_i32_0 = arith.constant 0 : i32
    %c0_i32_1 = arith.constant 0 : i32
    return %c0_i32, %c0_i32_0 : i32, i32
  }
  func.func @transform_3(%arg0: i32) -> (i32, i32) {
    %c0_i32 = arith.constant 0 : i32
    %c0_i32_0 = arith.constant 0 : i32
    %c0_i32_1 = arith.constant 0 : i32
    return %c0_i32, %c0_i32_0 : i32, i32
  }
  func.func @transform_4(%arg0: i32) -> (i32, i32) {
    %c0_i32 = arith.constant 0 : i32
    %c0_i32_0 = arith.constant 0 : i32
    %c0_i32_1 = arith.constant 0 : i32
    return %c0_i32, %c0_i32_0 : i32, i32
  }
  func.func @transform_5(%arg0: i32) -> (i32, i32) {
    %c0_i32 = arith.constant 0 : i32
    %c0_i32_0 = arith.constant 0 : i32
    %c0_i32_1 = arith.constant 0 : i32
    return %c0_i32, %c0_i32_0 : i32, i32
  }
  func.func @transform_6(%arg0: i32) -> (i32, i32) {
    %c0_i32 = arith.constant 0 : i32
    %c0_i32_0 = arith.constant 0 : i32
    %c0_i32_1 = arith.constant 0 : i32
    return %c0_i32, %c0_i32_0 : i32, i32
  }
  func.func @transform_7(%arg0: i32) -> (i32, i32, i32) {
    %c0_i32 = arith.constant 0 : i32
    %c0_i32_0 = arith.constant 0 : i32
    %c0_i32_1 = arith.constant 0 : i32
    return %arg0, %c0_i32, %c0_i32_0 : i32, i32, i32
  }
}

module attributes {stable_mosaic.version = 11 : i64} {
  func.func @_ln_mlp_kernel(%arg0: i32, %arg1: memref<16x32xf32, #tpu.memory_space<vmem>>, %arg2: memref<1x32xf32, #tpu.memory_space<vmem>>, %arg3: memref<1x32xf32, #tpu.memory_space<vmem>>, %arg4: memref<32x64xbf16, #tpu.memory_space<vmem>>, %arg5: memref<1x64xf32, #tpu.memory_space<vmem>>, %arg6: memref<64x32xbf16, #tpu.memory_space<vmem>>, %arg7: memref<1x32xf32, #tpu.memory_space<vmem>>, %arg8: memref<16x32xf32, #tpu.memory_space<vmem>>) attributes {dimension_semantics = [#tpu.dimension_semantics<parallel>], iteration_bounds = array<i64: 2>, scalar_prefetch = 0 : i64, scratch_operands = 0 : i64, tpu.core_type = #tpu.core_type<tc>, window_params = [{transform_indices = @transform_0, window_bounds = array<i64: 16, 32>}, {pipeline_mode = #tpu.pipeline_mode<synchronous>, transform_indices = @transform_1, window_bounds = array<i64: 1, 32>}, {pipeline_mode = #tpu.pipeline_mode<synchronous>, transform_indices = @transform_2, window_bounds = array<i64: 1, 32>}, {pipeline_mode = #tpu.pipeline_mode<synchronous>, transform_indices = @transform_3, window_bounds = array<i64: 32, 64>}, {pipeline_mode = #tpu.pipeline_mode<synchronous>, transform_indices = @transform_4, window_bounds = array<i64: 1, 64>}, {pipeline_mode = #tpu.pipeline_mode<synchronous>, transform_indices = @transform_5, window_bounds = array<i64: 64, 32>}, {pipeline_mode = #tpu.pipeline_mode<synchronous>, transform_indices = @transform_6, window_bounds = array<i64: 1, 32>}, {transform_indices = @transform_7, window_bounds = array<i64: 16, 32>}]} {
    %c0 = arith.constant 0 : index
    %c0_0 = arith.constant 0 : index
    %0 = vector.load %arg1[%c0, %c0_0] : memref<16x32xf32, #tpu.memory_space<vmem>>, vector<16x32xf32>
    %cst = arith.constant dense<0.000000e+00> : vector<16xf32>
    %1 = vector.multi_reduction <add>, %0, %cst [1] : vector<16x32xf32> to vector<16xf32>
    %2 = vector.shape_cast %1 : vector<16xf32> to vector<16x1xf32>
    %cst_1 = arith.constant 3.200000e+01 : f32
    %3 = vector.broadcast %cst_1 : f32 to vector<16x1xf32>
    %4 = arith.divf %2, %3 : vector<16x1xf32>
    %5 = vector.broadcast %4 : vector<16x1xf32> to vector<16x32xf32>
    %6 = arith.subf %0, %5 : vector<16x32xf32>
    %7 = arith.mulf %6, %6 : vector<16x32xf32>
    %cst_2 = arith.constant dense<0.000000e+00> : vector<16xf32>
    %8 = vector.multi_reduction <add>, %7, %cst_2 [1] : vector<16x32xf32> to vector<16xf32>
    %9 = vector.shape_cast %8 : vector<16xf32> to vector<16x1xf32>
    %cst_3 = arith.constant 3.200000e+01 : f32
    %10 = vector.broadcast %cst_3 : f32 to vector<16x1xf32>
    %11 = arith.divf %9, %10 : vector<16x1xf32>
    %cst_4 = arith.constant 9.99999997E-7 : f32
    %12 = vector.broadcast %cst_4 : f32 to vector<16x1xf32>
    %13 = arith.addf %11, %12 : vector<16x1xf32>
    %14 = math.rsqrt %13 : vector<16x1xf32>
    %15 = vector.broadcast %14 : vector<16x1xf32> to vector<16x32xf32>
    %16 = arith.mulf %6, %15 : vector<16x32xf32>
    %c0_5 = arith.constant 0 : index
    %c0_6 = arith.constant 0 : index
    %17 = vector.load %arg2[%c0_5, %c0_6] : memref<1x32xf32, #tpu.memory_space<vmem>>, vector<1x32xf32>
    %18 = vector.broadcast %17 : vector<1x32xf32> to vector<16x32xf32>
    %19 = arith.mulf %16, %18 : vector<16x32xf32>
    %c0_7 = arith.constant 0 : index
    %c0_8 = arith.constant 0 : index
    %20 = vector.load %arg3[%c0_7, %c0_8] : memref<1x32xf32, #tpu.memory_space<vmem>>, vector<1x32xf32>
    %21 = vector.broadcast %20 : vector<1x32xf32> to vector<16x32xf32>
    %22 = arith.addf %19, %21 : vector<16x32xf32>
    %23 = arith.truncf %22 : vector<16x32xf32> to vector<16x32xbf16>
    %c0_9 = arith.constant 0 : index
    %c0_10 = arith.constant 0 : index
    %24 = vector.load %arg4[%c0_9, %c0_10] : memref<32x64xbf16, #tpu.memory_space<vmem>>, vector<32x64xbf16>
    %cst_11 = arith.constant dense<0.000000e+00> : vector<16x64xf32>
    %25 = tpu.matmul %23, %24, %cst_11 {dimension_numbers = #tpu.dot_dimension_numbers<[1], [0], [0], [1], [0, 0, 1, 1], [], []>} : vector<16x32xbf16>, vector<32x64xbf16>, vector<16x64xf32> -> vector<16x64xf32>
    %c0_12 = arith.constant 0 : index
    %c0_13 = arith.constant 0 : index
    %26 = vector.load %arg5[%c0_12, %c0_13] : memref<1x64xf32, #tpu.memory_space<vmem>>, vector<1x64xf32>
    %27 = vector.broadcast %26 : vector<1x64xf32> to vector<16x64xf32>
    %28 = arith.addf %25, %27 : vector<16x64xf32>
    %cst_14 = arith.constant 5.000000e-01 : f32
    %29 = vector.broadcast %cst_14 : f32 to vector<16x64xf32>
    %30 = arith.mulf %29, %28 : vector<16x64xf32>
    %cst_15 = arith.constant 0.707106769 : f32
    %31 = vector.broadcast %cst_15 : f32 to vector<16x64xf32>
    %32 = arith.mulf %28, %31 : vector<16x64xf32>
    %33 = math.erf %32 : vector<16x64xf32>
    %cst_16 = arith.constant 1.000000e+00 : f32
    %34 = vector.broadcast %cst_16 : f32 to vector<16x64xf32>
    %35 = arith.addf %34, %33 : vector<16x64xf32>
    %36 = arith.mulf %30, %35 : vector<16x64xf32>
    %37 = arith.truncf %36 : vector<16x64xf32> to vector<16x64xbf16>
    %c0_17 = arith.constant 0 : index
    %c0_18 = arith.constant 0 : index
    %38 = vector.load %arg6[%c0_17, %c0_18] : memref<64x32xbf16, #tpu.memory_space<vmem>>, vector<64x32xbf16>
    %cst_19 = arith.constant dense<0.000000e+00> : vector<16x32xf32>
    %39 = tpu.matmul %37, %38, %cst_19 {dimension_numbers = #tpu.dot_dimension_numbers<[1], [0], [0], [1], [0, 0, 1, 1], [], []>} : vector<16x64xbf16>, vector<64x32xbf16>, vector<16x32xf32> -> vector<16x32xf32>
    %c0_20 = arith.constant 0 : index
    %c0_21 = arith.constant 0 : index
    %40 = vector.load %arg7[%c0_20, %c0_21] : memref<1x32xf32, #tpu.memory_space<vmem>>, vector<1x32xf32>
    %41 = vector.broadcast %40 : vector<1x32xf32> to vector<16x32xf32>
    %42 = arith.addf %39, %41 : vector<16x32xf32>
    %43 = arith.addf %0, %42 : vector<16x32xf32>
    %c0_22 = arith.constant 0 : index
    %c0_23 = arith.constant 0 : index
    %44 = vector.load %arg8[%c0_22, %c0_23] : memref<16x32xf32, #tpu.memory_space<vmem>>, vector<16x32xf32>
    tpu.vector_store %arg8[%c0_22, %c0_23], %43 {strides = array<i32>} : memref<16x32xf32, #tpu.memory_space<vmem>>, vector<16x32xf32>,
    return
  }
  func.func @transform_0(%arg0: i32) -> (i32, i32) {
    %c0_i32 = arith.constant 0 : i32
    %c0_i32_0 = arith.constant 0 : i32
    return %arg0, %c0_i32 : i32, i32
  }
  func.func @transform_1(%arg0: i32) -> (i32, i32) {
    %c0_i32 = arith.constant 0 : i32
    %c0_i32_0 = arith.constant 0 : i32
    %c0_i32_1 = arith.constant 0 : i32
    return %c0_i32, %c0_i32_0 : i32, i32
  }
  func.func @transform_2(%arg0: i32) -> (i32, i32) {
    %c0_i32 = arith.constant 0 : i32
    %c0_i32_0 = arith.constant 0 : i32
    %c0_i32_1 = arith.constant 0 : i32
    return %c0_i32, %c0_i32_0 : i32, i32
  }
  func.func @transform_3(%arg0: i32) -> (i32, i32) {
    %c0_i32 = arith.constant 0 : i32
    %c0_i32_0 = arith.constant 0 : i32
    %c0_i32_1 = arith.constant 0 : i32
    return %c0_i32, %c0_i32_0 : i32, i32
  }
  func.func @transform_4(%arg0: i32) -> (i32, i32) {
    %c0_i32 = arith.constant 0 : i32
    %c0_i32_0 = arith.constant 0 : i32
    %c0_i32_1 = arith.constant 0 : i32
    return %c0_i32, %c0_i32_0 : i32, i32
  }
  func.func @transform_5(%arg0: i32) -> (i32, i32) {
    %c0_i32 = arith.constant 0 : i32
    %c0_i32_0 = arith.constant 0 : i32
    %c0_i32_1 = arith.constant 0 : i32
    return %c0_i32, %c0_i32_0 : i32, i32
  }
  func.func @transform_6(%arg0: i32) -> (i32, i32) {
    %c0_i32 = arith.constant 0 : i32
    %c0_i32_0 = arith.constant 0 : i32
    %c0_i32_1 = arith.constant 0 : i32
    return %c0_i32, %c0_i32_0 : i32, i32
  }
  func.func @transform_7(%arg0: i32) -> (i32, i32) {
    %c0_i32 = arith.constant 0 : i32
    %c0_i32_0 = arith.constant 0 : i32
    return %arg0, %c0_i32 : i32, i32
  }
}

module attributes {stable_mosaic.version = 11 : i64} {
  func.func @_attn_block_kernel(%arg0: i32, %arg1: memref<1x10x32xf32, #tpu.memory_space<vmem>>, %arg2: memref<1x32xf32, #tpu.memory_space<vmem>>, %arg3: memref<1x32xf32, #tpu.memory_space<vmem>>, %arg4: memref<32x96xbf16, #tpu.memory_space<vmem>>, %arg5: memref<1x96xf32, #tpu.memory_space<vmem>>, %arg6: memref<32x32xbf16, #tpu.memory_space<vmem>>, %arg7: memref<1x32xf32, #tpu.memory_space<vmem>>, %arg8: memref<1x10x32xf32, #tpu.memory_space<vmem>>, %arg9: memref<10x32xf32, #tpu.memory_space<vmem>>) attributes {dimension_semantics = [#tpu.dimension_semantics<parallel>], iteration_bounds = array<i64: 2>, scalar_prefetch = 0 : i64, scratch_operands = 1 : i64, tpu.core_type = #tpu.core_type<tc>, window_params = [{transform_indices = @transform_0, window_bounds = array<i64: 1, 10, 32>}, {pipeline_mode = #tpu.pipeline_mode<synchronous>, transform_indices = @transform_1, window_bounds = array<i64: 1, 32>}, {pipeline_mode = #tpu.pipeline_mode<synchronous>, transform_indices = @transform_2, window_bounds = array<i64: 1, 32>}, {pipeline_mode = #tpu.pipeline_mode<synchronous>, transform_indices = @transform_3, window_bounds = array<i64: 32, 96>}, {pipeline_mode = #tpu.pipeline_mode<synchronous>, transform_indices = @transform_4, window_bounds = array<i64: 1, 96>}, {pipeline_mode = #tpu.pipeline_mode<synchronous>, transform_indices = @transform_5, window_bounds = array<i64: 32, 32>}, {pipeline_mode = #tpu.pipeline_mode<synchronous>, transform_indices = @transform_6, window_bounds = array<i64: 1, 32>}, {transform_indices = @transform_7, window_bounds = array<i64: 1, 10, 32>}]} {
    %c0 = arith.constant 0 : index
    %c0_0 = arith.constant 0 : index
    %c0_1 = arith.constant 0 : index
    %0 = vector.load %arg1[%c0, %c0_0, %c0_1] : memref<1x10x32xf32, #tpu.memory_space<vmem>>, vector<1x10x32xf32>
    %1 = vector.shape_cast %0 : vector<1x10x32xf32> to vector<10x32xf32>
    %2 = arith.truncf %1 : vector<10x32xf32> to vector<10x32xbf16>
    %c0_2 = arith.constant 0 : index
    %c0_3 = arith.constant 0 : index
    %3 = vector.load %arg4[%c0_2, %c0_3] : memref<32x96xbf16, #tpu.memory_space<vmem>>, vector<32x96xbf16>
    %cst = arith.constant dense<0.000000e+00> : vector<10x96xf32>
    %4 = tpu.matmul %2, %3, %cst {dimension_numbers = #tpu.dot_dimension_numbers<[1], [0], [0], [1], [0, 0, 1, 1], [], []>} : vector<10x32xbf16>, vector<32x96xbf16>, vector<10x96xf32> -> vector<10x96xf32>
    %c0_4 = arith.constant 0 : index
    %c0_5 = arith.constant 0 : index
    %5 = vector.load %arg5[%c0_4, %c0_5] : memref<1x96xf32, #tpu.memory_space<vmem>>, vector<1x96xf32>
    %6 = vector.broadcast %5 : vector<1x96xf32> to vector<10x96xf32>
    %7 = arith.addf %4, %6 : vector<10x96xf32>
    %8 = vector.extract_strided_slice %7 {offsets = [0, 0], sizes = [10, 8], strides = [1, 1]} : vector<10x96xf32> to vector<10x8xf32>
    %9 = arith.truncf %8 : vector<10x8xf32> to vector<10x8xbf16>
    %10 = vector.extract_strided_slice %7 {offsets = [0, 32], sizes = [10, 8], strides = [1, 1]} : vector<10x96xf32> to vector<10x8xf32>
    %11 = arith.truncf %10 : vector<10x8xf32> to vector<10x8xbf16>
    %12 = vector.extract_strided_slice %7 {offsets = [0, 64], sizes = [10, 8], strides = [1, 1]} : vector<10x96xf32> to vector<10x8xf32>
    %13 = arith.truncf %12 : vector<10x8xf32> to vector<10x8xbf16>
    %cst_6 = arith.constant dense<0.000000e+00> : vector<10x10xf32>
    %14 = tpu.matmul %9, %11, %cst_6 {dimension_numbers = #tpu.dot_dimension_numbers<[1], [1], [0], [0], [0, 0, 1, 0], [], []>} : vector<10x8xbf16>, vector<10x8xbf16>, vector<10x10xf32> -> vector<10x10xf32>
    %cst_7 = arith.constant 0.353553385 : f32
    %15 = vector.broadcast %cst_7 : f32 to vector<10x10xf32>
    %16 = arith.mulf %14, %15 : vector<10x10xf32>
    %cst_8 = arith.constant dense<0xFF800000> : vector<10xf32>
    %17 = vector.multi_reduction <maximumf>, %16, %cst_8 [1] : vector<10x10xf32> to vector<10xf32>
    %18 = vector.shape_cast %17 : vector<10xf32> to vector<10x1xf32>
    %19 = vector.broadcast %18 : vector<10x1xf32> to vector<10x10xf32>
    %20 = arith.subf %16, %19 : vector<10x10xf32>
    %21 = math.exp %20 : vector<10x10xf32>
    %cst_9 = arith.constant dense<0.000000e+00> : vector<10xf32>
    %22 = vector.multi_reduction <add>, %21, %cst_9 [1] : vector<10x10xf32> to vector<10xf32>
    %23 = vector.shape_cast %22 : vector<10xf32> to vector<10x1xf32>
    %24 = tpu.reciprocal %23 {approx = true} : vector<10x1xf32> -> vector<10x1xf32>
    %25 = vector.broadcast %24 : vector<10x1xf32> to vector<10x10xf32>
    %26 = arith.mulf %21, %25 : vector<10x10xf32>
    %27 = arith.truncf %26 : vector<10x10xf32> to vector<10x10xbf16>
    %cst_10 = arith.constant dense<0.000000e+00> : vector<10x8xf32>
    %28 = tpu.matmul %27, %13, %cst_10 {dimension_numbers = #tpu.dot_dimension_numbers<[1], [0], [0], [1], [0, 0, 1, 1], [], []>} : vector<10x10xbf16>, vector<10x8xbf16>, vector<10x8xf32> -> vector<10x8xf32>
    %c0_11 = arith.constant 0 : index
    %c0_12 = arith.constant 0 : index
    %29 = vector.load %arg9[%c0_11, %c0_12] : memref<10x32xf32, #tpu.memory_space<vmem>>, vector<10x8xf32>
    tpu.vector_store %arg9[%c0_11, %c0_12], %28 {strides = array<i32>} : memref<10x32xf32, #tpu.memory_space<vmem>>, vector<10x8xf32>,
    %30 = vector.extract_strided_slice %7 {offsets = [0, 8], sizes = [10, 8], strides = [1, 1]} : vector<10x96xf32> to vector<10x8xf32>
    %31 = arith.truncf %30 : vector<10x8xf32> to vector<10x8xbf16>
    %32 = vector.extract_strided_slice %7 {offsets = [0, 40], sizes = [10, 8], strides = [1, 1]} : vector<10x96xf32> to vector<10x8xf32>
    %33 = arith.truncf %32 : vector<10x8xf32> to vector<10x8xbf16>
    %34 = vector.extract_strided_slice %7 {offsets = [0, 72], sizes = [10, 8], strides = [1, 1]} : vector<10x96xf32> to vector<10x8xf32>
    %35 = arith.truncf %34 : vector<10x8xf32> to vector<10x8xbf16>
    %cst_13 = arith.constant dense<0.000000e+00> : vector<10x10xf32>
    %36 = tpu.matmul %31, %33, %cst_13 {dimension_numbers = #tpu.dot_dimension_numbers<[1], [1], [0], [0], [0, 0, 1, 0], [], []>} : vector<10x8xbf16>, vector<10x8xbf16>, vector<10x10xf32> -> vector<10x10xf32>
    %cst_14 = arith.constant 0.353553385 : f32
    %37 = vector.broadcast %cst_14 : f32 to vector<10x10xf32>
    %38 = arith.mulf %36, %37 : vector<10x10xf32>
    %cst_15 = arith.constant dense<0xFF800000> : vector<10xf32>
    %39 = vector.multi_reduction <maximumf>, %38, %cst_15 [1] : vector<10x10xf32> to vector<10xf32>
    %40 = vector.shape_cast %39 : vector<10xf32> to vector<10x1xf32>
    %41 = vector.broadcast %40 : vector<10x1xf32> to vector<10x10xf32>
    %42 = arith.subf %38, %41 : vector<10x10xf32>
    %43 = math.exp %42 : vector<10x10xf32>
    %cst_16 = arith.constant dense<0.000000e+00> : vector<10xf32>
    %44 = vector.multi_reduction <add>, %43, %cst_16 [1] : vector<10x10xf32> to vector<10xf32>
    %45 = vector.shape_cast %44 : vector<10xf32> to vector<10x1xf32>
    %46 = tpu.reciprocal %45 {approx = true} : vector<10x1xf32> -> vector<10x1xf32>
    %47 = vector.broadcast %46 : vector<10x1xf32> to vector<10x10xf32>
    %48 = arith.mulf %43, %47 : vector<10x10xf32>
    %49 = arith.truncf %48 : vector<10x10xf32> to vector<10x10xbf16>
    %cst_17 = arith.constant dense<0.000000e+00> : vector<10x8xf32>
    %50 = tpu.matmul %49, %35, %cst_17 {dimension_numbers = #tpu.dot_dimension_numbers<[1], [0], [0], [1], [0, 0, 1, 1], [], []>} : vector<10x10xbf16>, vector<10x8xbf16>, vector<10x8xf32> -> vector<10x8xf32>
    %c0_18 = arith.constant 0 : index
    %c8 = arith.constant 8 : index
    %51 = vector.load %arg9[%c0_18, %c8] : memref<10x32xf32, #tpu.memory_space<vmem>>, vector<10x8xf32>
    tpu.vector_store %arg9[%c0_18, %c8], %50 {strides = array<i32>} : memref<10x32xf32, #tpu.memory_space<vmem>>, vector<10x8xf32>,
    %52 = vector.extract_strided_slice %7 {offsets = [0, 16], sizes = [10, 8], strides = [1, 1]} : vector<10x96xf32> to vector<10x8xf32>
    %53 = arith.truncf %52 : vector<10x8xf32> to vector<10x8xbf16>
    %54 = vector.extract_strided_slice %7 {offsets = [0, 48], sizes = [10, 8], strides = [1, 1]} : vector<10x96xf32> to vector<10x8xf32>
    %55 = arith.truncf %54 : vector<10x8xf32> to vector<10x8xbf16>
    %56 = vector.extract_strided_slice %7 {offsets = [0, 80], sizes = [10, 8], strides = [1, 1]} : vector<10x96xf32> to vector<10x8xf32>
    %57 = arith.truncf %56 : vector<10x8xf32> to vector<10x8xbf16>
    %cst_19 = arith.constant dense<0.000000e+00> : vector<10x10xf32>
    %58 = tpu.matmul %53, %55, %cst_19 {dimension_numbers = #tpu.dot_dimension_numbers<[1], [1], [0], [0], [0, 0, 1, 0], [], []>} : vector<10x8xbf16>, vector<10x8xbf16>, vector<10x10xf32> -> vector<10x10xf32>
    %cst_20 = arith.constant 0.353553385 : f32
    %59 = vector.broadcast %cst_20 : f32 to vector<10x10xf32>
    %60 = arith.mulf %58, %59 : vector<10x10xf32>
    %cst_21 = arith.constant dense<0xFF800000> : vector<10xf32>
    %61 = vector.multi_reduction <maximumf>, %60, %cst_21 [1] : vector<10x10xf32> to vector<10xf32>
    %62 = vector.shape_cast %61 : vector<10xf32> to vector<10x1xf32>
    %63 = vector.broadcast %62 : vector<10x1xf32> to vector<10x10xf32>
    %64 = arith.subf %60, %63 : vector<10x10xf32>
    %65 = math.exp %64 : vector<10x10xf32>
    %cst_22 = arith.constant dense<0.000000e+00> : vector<10xf32>
    %66 = vector.multi_reduction <add>, %65, %cst_22 [1] : vector<10x10xf32> to vector<10xf32>
    %67 = vector.shape_cast %66 : vector<10xf32> to vector<10x1xf32>
    %68 = tpu.reciprocal %67 {approx = true} : vector<10x1xf32> -> vector<10x1xf32>
    %69 = vector.broadcast %68 : vector<10x1xf32> to vector<10x10xf32>
    %70 = arith.mulf %65, %69 : vector<10x10xf32>
    %71 = arith.truncf %70 : vector<10x10xf32> to vector<10x10xbf16>
    %cst_23 = arith.constant dense<0.000000e+00> : vector<10x8xf32>
    %72 = tpu.matmul %71, %57, %cst_23 {dimension_numbers = #tpu.dot_dimension_numbers<[1], [0], [0], [1], [0, 0, 1, 1], [], []>} : vector<10x10xbf16>, vector<10x8xbf16>, vector<10x8xf32> -> vector<10x8xf32>
    %c0_24 = arith.constant 0 : index
    %c16 = arith.constant 16 : index
    %73 = vector.load %arg9[%c0_24, %c16] : memref<10x32xf32, #tpu.memory_space<vmem>>, vector<10x8xf32>
    tpu.vector_store %arg9[%c0_24, %c16], %72 {strides = array<i32>} : memref<10x32xf32, #tpu.memory_space<vmem>>, vector<10x8xf32>,
    %74 = vector.extract_strided_slice %7 {offsets = [0, 24], sizes = [10, 8], strides = [1, 1]} : vector<10x96xf32> to vector<10x8xf32>
    %75 = arith.truncf %74 : vector<10x8xf32> to vector<10x8xbf16>
    %76 = vector.extract_strided_slice %7 {offsets = [0, 56], sizes = [10, 8], strides = [1, 1]} : vector<10x96xf32> to vector<10x8xf32>
    %77 = arith.truncf %76 : vector<10x8xf32> to vector<10x8xbf16>
    %78 = vector.extract_strided_slice %7 {offsets = [0, 88], sizes = [10, 8], strides = [1, 1]} : vector<10x96xf32> to vector<10x8xf32>
    %79 = arith.truncf %78 : vector<10x8xf32> to vector<10x8xbf16>
    %cst_25 = arith.constant dense<0.000000e+00> : vector<10x10xf32>
    %80 = tpu.matmul %75, %77, %cst_25 {dimension_numbers = #tpu.dot_dimension_numbers<[1], [1], [0], [0], [0, 0, 1, 0], [], []>} : vector<10x8xbf16>, vector<10x8xbf16>, vector<10x10xf32> -> vector<10x10xf32>
    %cst_26 = arith.constant 0.353553385 : f32
    %81 = vector.broadcast %cst_26 : f32 to vector<10x10xf32>
    %82 = arith.mulf %80, %81 : vector<10x10xf32>
    %cst_27 = arith.constant dense<0xFF800000> : vector<10xf32>
    %83 = vector.multi_reduction <maximumf>, %82, %cst_27 [1] : vector<10x10xf32> to vector<10xf32>
    %84 = vector.shape_cast %83 : vector<10xf32> to vector<10x1xf32>
    %85 = vector.broadcast %84 : vector<10x1xf32> to vector<10x10xf32>
    %86 = arith.subf %82, %85 : vector<10x10xf32>
    %87 = math.exp %86 : vector<10x10xf32>
    %cst_28 = arith.constant dense<0.000000e+00> : vector<10xf32>
    %88 = vector.multi_reduction <add>, %87, %cst_28 [1] : vector<10x10xf32> to vector<10xf32>
    %89 = vector.shape_cast %88 : vector<10xf32> to vector<10x1xf32>
    %90 = tpu.reciprocal %89 {approx = true} : vector<10x1xf32> -> vector<10x1xf32>
    %91 = vector.broadcast %90 : vector<10x1xf32> to vector<10x10xf32>
    %92 = arith.mulf %87, %91 : vector<10x10xf32>
    %93 = arith.truncf %92 : vector<10x10xf32> to vector<10x10xbf16>
    %cst_29 = arith.constant dense<0.000000e+00> : vector<10x8xf32>
    %94 = tpu.matmul %93, %79, %cst_29 {dimension_numbers = #tpu.dot_dimension_numbers<[1], [0], [0], [1], [0, 0, 1, 1], [], []>} : vector<10x10xbf16>, vector<10x8xbf16>, vector<10x8xf32> -> vector<10x8xf32>
    %c0_30 = arith.constant 0 : index
    %c24 = arith.constant 24 : index
    %95 = vector.load %arg9[%c0_30, %c24] : memref<10x32xf32, #tpu.memory_space<vmem>>, vector<10x8xf32>
    tpu.vector_store %arg9[%c0_30, %c24], %94 {strides = array<i32>} : memref<10x32xf32, #tpu.memory_space<vmem>>, vector<10x8xf32>,
    %c0_31 = arith.constant 0 : index
    %c0_32 = arith.constant 0 : index
    %96 = vector.load %arg9[%c0_31, %c0_32] : memref<10x32xf32, #tpu.memory_space<vmem>>, vector<10x32xf32>
    %97 = arith.truncf %96 : vector<10x32xf32> to vector<10x32xbf16>
    %c0_33 = arith.constant 0 : index
    %c0_34 = arith.constant 0 : index
    %98 = vector.load %arg6[%c0_33, %c0_34] : memref<32x32xbf16, #tpu.memory_space<vmem>>, vector<32x32xbf16>
    %cst_35 = arith.constant dense<0.000000e+00> : vector<10x32xf32>
    %99 = tpu.matmul %97, %98, %cst_35 {dimension_numbers = #tpu.dot_dimension_numbers<[1], [0], [0], [1], [0, 0, 1, 1], [], []>} : vector<10x32xbf16>, vector<32x32xbf16>, vector<10x32xf32> -> vector<10x32xf32>
    %c0_36 = arith.constant 0 : index
    %c0_37 = arith.constant 0 : index
    %100 = vector.load %arg7[%c0_36, %c0_37] : memref<1x32xf32, #tpu.memory_space<vmem>>, vector<1x32xf32>
    %101 = vector.broadcast %100 : vector<1x32xf32> to vector<10x32xf32>
    %102 = arith.addf %99, %101 : vector<10x32xf32>
    %c0_38 = arith.constant 0 : index
    %c0_39 = arith.constant 0 : index
    %c0_40 = arith.constant 0 : index
    %103 = vector.load %arg8[%c0_38, %c0_39, %c0_40] : memref<1x10x32xf32, #tpu.memory_space<vmem>>, vector<1x10x32xf32>
    %104 = vector.shape_cast %103 : vector<1x10x32xf32> to vector<10x32xf32>
    %105 = vector.shape_cast %102 : vector<10x32xf32> to vector<1x10x32xf32>
    tpu.vector_store %arg8[%c0_38, %c0_39, %c0_40], %105 {strides = array<i32>} : memref<1x10x32xf32, #tpu.memory_space<vmem>>, vector<1x10x32xf32>,
    return
  }
  func.func @transform_0(%arg0: i32) -> (i32, i32, i32) {
    %c0_i32 = arith.constant 0 : i32
    %c0_i32_0 = arith.constant 0 : i32
    %c0_i32_1 = arith.constant 0 : i32
    return %arg0, %c0_i32, %c0_i32_0 : i32, i32, i32
  }
  func.func @transform_1(%arg0: i32) -> (i32, i32) {
    %c0_i32 = arith.constant 0 : i32
    %c0_i32_0 = arith.constant 0 : i32
    %c0_i32_1 = arith.constant 0 : i32
    return %c0_i32, %c0_i32_0 : i32, i32
  }
  func.func @transform_2(%arg0: i32) -> (i32, i32) {
    %c0_i32 = arith.constant 0 : i32
    %c0_i32_0 = arith.constant 0 : i32
    %c0_i32_1 = arith.constant 0 : i32
    return %c0_i32, %c0_i32_0 : i32, i32
  }
  func.func @transform_3(%arg0: i32) -> (i32, i32) {
    %c0_i32 = arith.constant 0 : i32
    %c0_i32_0 = arith.constant 0 : i32
    %c0_i32_1 = arith.constant 0 : i32
    return %c0_i32, %c0_i32_0 : i32, i32
  }
  func.func @transform_4(%arg0: i32) -> (i32, i32) {
    %c0_i32 = arith.constant 0 : i32
    %c0_i32_0 = arith.constant 0 : i32
    %c0_i32_1 = arith.constant 0 : i32
    return %c0_i32, %c0_i32_0 : i32, i32
  }
  func.func @transform_5(%arg0: i32) -> (i32, i32) {
    %c0_i32 = arith.constant 0 : i32
    %c0_i32_0 = arith.constant 0 : i32
    %c0_i32_1 = arith.constant 0 : i32
    return %c0_i32, %c0_i32_0 : i32, i32
  }
  func.func @transform_6(%arg0: i32) -> (i32, i32) {
    %c0_i32 = arith.constant 0 : i32
    %c0_i32_0 = arith.constant 0 : i32
    %c0_i32_1 = arith.constant 0 : i32
    return %c0_i32, %c0_i32_0 : i32, i32
  }
  func.func @transform_7(%arg0: i32) -> (i32, i32, i32) {
    %c0_i32 = arith.constant 0 : i32
    %c0_i32_0 = arith.constant 0 : i32
    %c0_i32_1 = arith.constant 0 : i32
    return %arg0, %c0_i32, %c0_i32_0 : i32, i32, i32
  }
}

</mosaic_0001>

<bundles_post_ra>
// kernel: wdisi_forward.8
= control target key start
LH: loop header
LB: loop body
LE: loop exit
PB: predicated region body
PF: predicated region fallthrough
CT: control target
= control target key end

     0   :  { %s679_s24 = smov 0   ;;  %s750_s0 = inlined_call_operand.vmem [shape: f32[32,32], index: 0, kind: input, shape index: {}]   ;;  %s751_s1 = inlined_call_operand.vmem [shape: f32[1,32], index: 1, kind: input, shape index: {}]   ;;  %s752_s2 = inlined_call_operand.vmem [shape: f32[1,32], index: 2, kind: input, shape index: {}]   ;;  %s753_s3 = inlined_call_operand.vmem [shape: bf16[32,64], index: 3, kind: input, shape index: {}]   ;;  %s754_s4 = inlined_call_operand.vmem [shape: f32[1,64], index: 4, kind: input, shape index: {}]   ;;  %s755_s5 = inlined_call_operand.vmem [shape: bf16[64,32], index: 5, kind: input, shape index: {}]   ;;  %s756_s6 = inlined_call_operand.vmem [shape: f32[1,32], index: 6, kind: input, shape index: {}]   ;;  %s757_s7 = inlined_call_operand.vmem [shape: f32[32,32], index: 7, kind: output, shape index: {}]  }
   0x1 LB: > { %s554_s25 = sadd.s32 4294967295, %s635_s24   ;;  %p558_p0 = scmp.ge.s32.totalorder %s635_s24, 1  ;;  %s635_s24 = sphi %s679_s24, %s17_s24  }
   0x2   : > { %p238_p1 = scmp.lt.s32.totalorder %s635_s24, 3 }
   0x4   : > { %p239_p2 = pnand %p558_p0, %p238_p1 }
   0x5   : > { %s559_s26 = sshll.u32 (!%p239_p2), %s554_s25, 1  ;;  %vm285_vm0 = vcmask (!%p239_p2), 261120   ;;  %v615_v14 = vld [vmem:[%s753_s3] sm:$0xff] (!%p239_p2)   ;;  %v637_v15 = vmov (!%p239_p2), 0.0   ;;  %v616_v16 = vld [vmem:[%s753_s3 + $0x8] sm:$0xff] (!%p239_p2)   ;;  %vm638_vm1 = vmmov (!%p239_p2), 0  }
   0x6   : > { %242 = sbr.rel (%p239_p2) target bundleno = 790 (0x316), region = 48  ;;  %p271_p3 = scmp.lt.s32.totalorder (!%p239_p2), %s559_s26, 3  ;;  %585 = vmatprep.subr.bf16.mxu0 (!%p239_p2), %v637_v15  ;;  %593 = vmatprep.subr.bf16.mxu1 (!%p239_p2), %v637_v15  ;;  %v563_v25 = vld [vmem:[%s751_s1] ss:$0 sm:$0xff] (!%p239_p2)  ;;  %v618_v35 = vld [vmem:[%s755_s5 + $0x8] sm:$0xff] (!%p239_p2)   ;;  %v619_v36 = vld [vmem:[%s755_s5 + $0x10] sm:$0xff] (!%p239_p2)  }
   0x7   : > { %586 = vmatpush3.bf16.msra.mxu0 (!%p239_p2), %v615_v14  ;;  %589 = vmatprep.mubr.msk.bf16.mxu0 (!%p239_p2), %vm638_vm1, %v637_v15  ;;  %v564_v29 = vld [vmem:[%s752_s2] ss:$0 sm:$0xff] (!%p239_p2)  ;;  %v620_v37 = vld [vmem:[%s755_s5 + $0x18] sm:$0xff] (!%p239_p2)   ;;  %vm449_vm2 = vcmask (!%p239_p2), 523264  }
   0x8   : > { %587 = vmatprep.subr.bf16.mxu0 (!%p239_p2), %v637_v15  ;;  %601 = vmatprep.mubr.msk.bf16.mxu1 (!%p239_p2), %vm638_vm1, %v637_v15  ;;  %v617_v34 = vld [vmem:[%s755_s5] sm:$0xff] (!%p239_p2)  }
   0x9   : > { %594 = vmatpush3.bf16.msra.mxu1 (!%p239_p2), %v617_v34  ;;  %v565_v38 = vld [vmem:[%s754_s4] ss:$0 sm:$0xff] (!%p239_p2) }
   0xa   : > { %595 = vmatprep.subr.bf16.mxu1 (!%p239_p2), %v637_v15  ;;  %v569_v56 = vld [vmem:[%s756_s6] ss:$0 sm:$0xff] (!%p239_p2) }
   0xb   : > { %588 = vmatpush3.bf16.msra.mxu0 (!%p239_p2), %v616_v16 }
   0xd   : > { %s759_s26 = smov (!%p271_p3, %s559_s26), 3  ;;  %596 = vmatpush3.bf16.msra.mxu1 %v618_v35 }
   0xe   : > { %s560_s27 = sshll.u32 %s759_s26, 3  ;;  %597 = vmatprep.subr.bf16.mxu1 %v637_v15 }
   0xf   : > { %s274_s30 = scalar_lea.vmem %s750_s0, %s560_s27  ;;  %s280_s10 = scalar_lea.vmem %s757_s7, %s560_s27 }
  0x10   : > { %v695_v0 = vld [vmem:[%s274_s30] sm:$0xff]  ;;  %v697_v1 = vld [vmem:[%s274_s30 + $0x8] sm:$0xff] }
  0x11   : > { %v286_v2 = vsel %vm285_vm0, %v695_v0, 0.0  ;;  %v289_v3 = vsel %vm285_vm0, %v697_v1, 0.0  ;;  %598 = vmatpush3.bf16.msra.mxu1 %v619_v36 }
  0x12   : > { %287 = vadd.xlane.f32.xlu0 %v286_v2  ;;  %599 = vmatprep.subr.bf16.mxu1 %v637_v15 }
  0x15   : > { %600 = vmatpush3.bf16.msra.mxu1 %v620_v37 }
  0x16   : > { %290 = vadd.xlane.f32.xlu0 %v289_v3 }
  0x9f   : > { %v288_v4 = vpop.xlane.xlu0 %287 }
  0xa0   : > { %v293_v5 = vmul.f32 0.03125, %v288_v4 }
  0xa2   : > { %v295_v6 = vsub.f32 %v695_v0, %v293_v5 }
  0xa3   : > { %v291_v7 = vpop.xlane.xlu0 %290 }
  0xa4   : > { %v294_v8 = vmul.f32 0.03125, %v291_v7  ;;  %v297_v9 = vmul.f32 %v295_v6, %v295_v6 }
  0xa6   : > { %v296_v10 = vsub.f32 %v697_v1, %v294_v8  ;;  %v299_v11 = vsel %vm285_vm0, %v297_v9, 0.0 }
  0xa7   : > { %300 = vadd.xlane.f32.xlu1 %v299_v11 }
  0xa8   : > { %v298_v12 = vmul.f32 %v296_v10, %v296_v10 }
  0xaa   : > { %v302_v13 = vsel %vm285_vm0, %v298_v12, 0.0 }
  0xab   : > { %303 = vadd.xlane.f32.xlu1 %v302_v13 }
 0x134   : > { %v301_v17 = vpop.xlane.xlu1 %300 }
 0x135   : > { %v305_v18 = vmul.f32 0.03125, %v301_v17 }
 0x137   : > { %v307_v19 = vadd.f32 1e-06, %v305_v18 }
 0x138   : > { %v304_v20 = vpop.xlane.xlu1 %303 }
 0x139   : > { %621 = vrsqrt.f32 %v307_v19  ;;  %v306_v21 = vmul.f32 0.03125, %v304_v20 }
 0x13b   : > { %v308_v22 = vadd.f32 1e-06, %v306_v21 }
 0x13d   : > { %623 = vrsqrt.f32 %v308_v22 }
 0x143   : > { %v622_v23 = vpop.eup %621 }
 0x144   : > { %v311_v24 = vmul.f32 %v622_v23, %v295_v6 }
 0x146   : > { %v320_v28 = vmul.f32 %v563_v25, %v311_v24 }
 0x147   : > { %v624_v26 = vpop.eup %623 }
 0x148   : > { %v312_v27 = vmul.f32 %v624_v26, %v296_v10  ;;  %v329_v31 = vadd.f32 %v564_v29, %v320_v28 }
 0x14a   : > { %v321_v30 = vmul.f32 %v563_v25, %v312_v27 }
 0x14c   : > { %v330_v32 = vadd.f32 %v564_v29, %v321_v30 }
 0x14e   : > { %v331_v33 = vpack.c.bf16 %v330_v32, %v329_v31 }
 0x150   : > { %590 = vmatmul.mubr.msk.bf16.vlgmr.msra.gmra.mrb[0].mxu0 %vm285_vm0, %v331_v33 }
 0x223   : > { %v392_v39 = vpop.f32.mrb[0].mxu0 }
 0x224   : > { %v393_v40 = vadd.f32 %v565_v38, %v392_v39  ;;  %v591_v41 = vpop.f32.mrb[1].mxu0 }
 0x225   : > { %v395_v42 = vpop.f32.mrb[2].mxu0 }
 0x226   : > { %v401_v43 = vmul.f32 0.70710677, %v393_v40  ;;  %v396_v44 = vadd.f32 %v565_v38, %v395_v42  ;;  %v592_v45 = vpop.f32.mrb[3].mxu0  ;;  %v399_v50 = vmul.f32 0.5, %v393_v40 }
 0x228   : > { %625 = verf.f32 %v401_v43  ;;  %v402_v46 = vmul.f32 0.70710677, %v396_v44  ;;  %v400_v51 = vmul.f32 0.5, %v396_v44 }
 0x22a   : > { %627 = verf.f32 %v402_v46 }
 0x232   : > { %v626_v47 = vpop.eup %625 }
 0x233   : > { %v405_v48 = vadd.f32 1.0, %v626_v47 }
 0x234   : > { %v628_v49 = vpop.eup %627 }
 0x235   : > { %v406_v52 = vadd.f32 1.0, %v628_v49  ;;  %v407_v53 = vmul.f32 %v405_v48, %v399_v50 }
 0x237   : > { %v408_v54 = vmul.f32 %v406_v52, %v400_v51 }
 0x239   : > { %v409_v55 = vpack.c.bf16 %v408_v54, %v407_v53 }
 0x23b   : > { %602 = vmatmul.mubr.msk.bf16.vlgmr.msra.gmra.mrb[0].mxu1 %vm449_vm2, %v409_v55 }
 0x30e   : > { %v487_v57 = vpop.f32.mrb[0].mxu1 }
 0x30f   : > { %v488_v58 = vadd.f32 %v569_v56, %v487_v57  ;;  %v603_v59 = vpop.f32.mrb[1].mxu1 }
 0x310   : > { %v490_v60 = vpop.f32.mrb[2].mxu1 }
 0x311   : > { %v494_v61 = vadd.f32 %v488_v58, %v695_v0  ;;  %v491_v62 = vadd.f32 %v569_v56, %v490_v60  ;;  %v604_v63 = vpop.f32.mrb[3].mxu1 }
 0x313   : > { %496 = vst.msk [vmem:[%s280_s10] sm:$0xff] %vm285_vm0, %v494_v61  ;;  %v495_v2 = vadd.f32 %v491_v62, %v697_v1 }
 0x315   : > { %497 = vst.msk [vmem:[%s280_s10 + $0x8] sm:$0xff] %vm285_vm0, %v495_v2 }
 0x316 PF: > { %s17_s24 = sadd.s32 1, %s635_s24  }
 0x317   : > { %p14_p4 = scmp.ge.s32.totalorder %s17_s24, 4  }
 0x319   :  { %16 = sbr.rel (!%p14_p4) target bundleno = 1 (0x1), region = 78 }

// kernel: wdisi_forward.6
= control target key start
LH: loop header
LB: loop body
LE: loop exit
PB: predicated region body
PF: predicated region fallthrough
CT: control target
= control target key end

     0   :  { %s957_s12 = smov 0   ;;  %s1137_s0 = inlined_call_operand.vmem [shape: f32[16,768], index: 0, kind: input, shape index: {}]   ;;  %s1138_s1 = inlined_call_operand.vmem [shape: bf16[768,32], index: 1, kind: input, shape index: {}]   ;;  %s1139_s2 = inlined_call_operand.vmem [shape: f32[1,32], index: 2, kind: input, shape index: {}]   ;;  %s1140_s3 = inlined_call_operand.vmem [shape: f32[16,32], index: 3, kind: output, shape index: {}]  }
   0x1 LB: > { %s748_s13 = sadd.s32 4294967295, %s935_s12   ;;  %p752_p0 = scmp.ge.s32.totalorder %s935_s12, 1  ;;  %s935_s12 = sphi %s957_s12, %s13_s12  }
   0x2   : > { %p137_p1 = scmp.lt.s32.totalorder %s935_s12, 3 }
   0x4   : > { %p138_p2 = pnand %p752_p0, %p137_p1 }
   0x5   : > { %v881_v0 = vld [vmem:[%s1138_s1 + $0x40] sm:$0xff] (!%p138_p2)   ;;  %v885_v4 = vld [vmem:[%s1138_s1 + $0x48] sm:$0xff] (!%p138_p2)   ;;  %v889_v8 = vld [vmem:[%s1138_s1 + $0x50] sm:$0xff] (!%p138_p2)   ;;  %p160_p3 = scmp.lt.s32.totalorder (!%p138_p2), %s748_s13, 1  ;;  %vm693_vm0 = vcmask (!%p138_p2), 261120  }
   0x6   : > { %141 = sbr.rel (%p138_p2) target bundleno = 288 (0x120), region = 32  ;;  %v882_v1 = vld [vmem:[%s1138_s1] sm:$0xff] (!%p138_p2)   ;;  %806 = vmatprep.subr.bf16.mxu0 (!%p138_p2), %v881_v0  ;;  %v886_v5 = vld [vmem:[%s1138_s1 + $0x8] sm:$0xff] (!%p138_p2)   ;;  %v890_v9 = vld [vmem:[%s1138_s1 + $0x10] sm:$0xff] (!%p138_p2)  }
   0x7   : > { %v883_v2 = vld [vmem:[%s1138_s1 + $0xc0] sm:$0xff] (!%p138_p2)   ;;  %807 = vmatpush3.bf16.msra.mxu0 (!%p138_p2), %v882_v1  ;;  %v887_v6 = vld [vmem:[%s1138_s1 + $0xc8] sm:$0xff] (!%p138_p2)   ;;  %v891_v10 = vld [vmem:[%s1138_s1 + $0xd0] sm:$0xff] (!%p138_p2)  }
   0x8   : > { %v884_v3 = vld [vmem:[%s1138_s1 + $0x80] sm:$0xff] (!%p138_p2)   ;;  %828 = vmatprep.subr.bf16.mxu1 (!%p138_p2), %v883_v2  ;;  %808 = vmatprep.subr.bf16.mxu0 (!%p138_p2), %v885_v4  ;;  %v888_v7 = vld [vmem:[%s1138_s1 + $0x88] sm:$0xff] (!%p138_p2)   ;;  %v892_v11 = vld [vmem:[%s1138_s1 + $0x90] sm:$0xff] (!%p138_p2)  }
   0x9   : > { %829 = vmatpush3.bf16.msra.mxu1 (!%p138_p2), %v884_v3  ;;  %v893_v12 = vld [vmem:[%s1138_s1 + $0x58] sm:$0xff] (!%p138_p2)   ;;  %v897_v16 = vld [vmem:[%s1138_s1 + $0x60] sm:$0xff] (!%p138_p2)   ;;  %v901_v20 = vld [vmem:[%s1138_s1 + $0x68] sm:$0xff] (!%p138_p2)  }
   0xa   : > { %830 = vmatprep.subr.bf16.mxu1 (!%p138_p2), %v887_v6  ;;  %v894_v13 = vld [vmem:[%s1138_s1 + $0x18] sm:$0xff] (!%p138_p2)   ;;  %v898_v17 = vld [vmem:[%s1138_s1 + $0x20] sm:$0xff] (!%p138_p2)   ;;  %v902_v21 = vld [vmem:[%s1138_s1 + $0x28] sm:$0xff] (!%p138_p2)  }
   0xb   : > { %809 = vmatpush3.bf16.msra.mxu0 (!%p138_p2), %v886_v5  ;;  %v895_v14 = vld [vmem:[%s1138_s1 + $0xd8] sm:$0xff] (!%p138_p2)   ;;  %v899_v18 = vld [vmem:[%s1138_s1 + $0xe0] sm:$0xff] (!%p138_p2)   ;;  %v903_v22 = vld [vmem:[%s1138_s1 + $0xe8] sm:$0xff] (!%p138_p2)  }
   0xc   : > { %810 = vmatprep.subr.bf16.mxu0 (!%p138_p2), %v889_v8  ;;  %v896_v15 = vld [vmem:[%s1138_s1 + $0x98] sm:$0xff] (!%p138_p2)   ;;  %v900_v19 = vld [vmem:[%s1138_s1 + $0xa0] sm:$0xff] (!%p138_p2)   ;;  %v904_v23 = vld [vmem:[%s1138_s1 + $0xa8] sm:$0xff] (!%p138_p2)  }
   0xd   : > { %831 = vmatpush3.bf16.msra.mxu1 %v888_v7  ;;  %s1142_s13 = smov (!%p160_p3, %s748_s13), 1  ;;  %v905_v24 = vld [vmem:[%s1138_s1 + $0x70] sm:$0xff]   ;;  %v909_v28 = vld [vmem:[%s1138_s1 + $0x78] sm:$0xff]   ;;  %v913_v36 = vld [vmem:[%s1138_s1 + $0x140] sm:$0xff]  }
   0xe   : > { %832 = vmatprep.subr.bf16.mxu1 %v891_v10  ;;  %s872_s14 = smul.u32 48, %s1142_s13  ;;  %v906_v25 = vld [vmem:[%s1138_s1 + $0x30] sm:$0xff]   ;;  %v910_v29 = vld [vmem:[%s1138_s1 + $0x38] sm:$0xff]   ;;  %v914_v39 = vld [vmem:[%s1138_s1 + $0x100] sm:$0xff]  }
   0xf   : > { %811 = vmatpush3.bf16.msra.mxu0 %v890_v9  ;;  %v907_v26 = vld [vmem:[%s1138_s1 + $0xf0] sm:$0xff]   ;;  %v911_v30 = vld [vmem:[%s1138_s1 + $0xf8] sm:$0xff]   ;;  %v915_v42 = vld [vmem:[%s1138_s1 + $0x148] sm:$0xff]  }
  0x10   : > { %812 = vmatprep.subr.bf16.mxu0 %v893_v12  ;;  %v908_v27 = vld [vmem:[%s1138_s1 + $0xb0] sm:$0xff]   ;;  %s1062_s25 = scalar_lea.vmem %s1137_s0, %s872_s14  ;;  %v912_v33 = vld [vmem:[%s1138_s1 + $0xb8] sm:$0xff]   ;;  %v916_v43 = vld [vmem:[%s1138_s1 + $0x108] sm:$0xff]  }
  0x11   : > { %833 = vmatpush3.bf16.msra.mxu1 %v892_v11  ;;  %v171_v31 = vld [vmem:[%s1062_s25 + $0x8] sm:$0xff]  ;;  %v170_v34 = vld [vmem:[%s1062_s25] sm:$0xff]  ;;  %v173_v37 = vld [vmem:[%s1062_s25 + $0x18] sm:$0xff] }
  0x12   : > { %834 = vmatprep.subr.bf16.mxu1 %v895_v14  ;;  %v177_v32 = vpack.c.bf16 %v171_v31, %v171_v31  ;;  %v176_v35 = vpack.c.bf16 %v170_v34, %v170_v34  ;;  %v179_v38 = vpack.c.bf16 %v173_v37, %v173_v37  ;;  %v172_v40 = vld [vmem:[%s1062_s25 + $0x10] sm:$0xff]  ;;  %v919_v46 = vld [vmem:[%s1138_s1 + $0x158] sm:$0xff]   ;;  %v921_v48 = vld [vmem:[%s1138_s1 + $0x160] sm:$0xff]  }
  0x13   : > { %813 = vmatpush3.bf16.msra.mxu0 %v894_v13  ;;  %v178_v41 = vpack.c.bf16 %v172_v40, %v172_v40  ;;  %v917_v44 = vld [vmem:[%s1138_s1 + $0x150] sm:$0xff]   ;;  %v920_v47 = vld [vmem:[%s1138_s1 + $0x118] sm:$0xff]   ;;  %v922_v49 = vld [vmem:[%s1138_s1 + $0x120] sm:$0xff]  }
  0x14   : > { %814 = vmatprep.subr.bf16.mxu0 %v897_v16  ;;  %605 = vmatprep.mubr.bf16.mxu0 %v177_v32  ;;  %v918_v45 = vld [vmem:[%s1138_s1 + $0x110] sm:$0xff]   ;;  %v923_v50 = vld [vmem:[%s1138_s1 + $0x168] sm:$0xff]   ;;  %v927_v56 = vld [vmem:[%s1138_s1 + $0x178] sm:$0xff]  }
  0x15   : > { %835 = vmatpush3.bf16.msra.mxu1 %v896_v15  ;;  %645 = vmatprep.mubr.bf16.mxu1 %v179_v38  ;;  %v175_v51 = vld [vmem:[%s1062_s25 + $0x28] sm:$0xff]  ;;  %v925_v54 = vld [vmem:[%s1138_s1 + $0x170] sm:$0xff]   ;;  %v928_v57 = vld [vmem:[%s1138_s1 + $0x138] sm:$0xff]  }
  0x16   : > { %836 = vmatprep.subr.bf16.mxu1 %v899_v18  ;;  %v181_v52 = vpack.c.bf16 %v175_v51, %v175_v51  ;;  %v924_v53 = vld [vmem:[%s1138_s1 + $0x128] sm:$0xff]   ;;  %v926_v55 = vld [vmem:[%s1138_s1 + $0x130] sm:$0xff]   ;;  %v174_v58 = vld [vmem:[%s1062_s25 + $0x20] sm:$0xff]  ;;  %s754_s25 = sshll.u32 %s1142_s13, 3 }
  0x17   : > { %815 = vmatpush3.bf16.msra.mxu0 %v898_v17  ;;  %v180_v59 = vpack.c.bf16 %v174_v58, %v174_v58  ;;  %v755_v61 = vld [vmem:[%s1139_s2] ss:$0 sm:$0xff]  ;;  %s168_s19 = scalar_lea.vmem %s1140_s3, %s754_s25 }
  0x18   : > { %816 = vmatprep.subr.bf16.mxu0 %v901_v20 }
  0x19   : > { %837 = vmatpush3.bf16.msra.mxu1 %v900_v19 }
  0x1a   : > { %838 = vmatprep.subr.bf16.mxu1 %v903_v22 }
  0x1b   : > { %817 = vmatpush3.bf16.msra.mxu0 %v902_v21 }
  0x1c   : > { %818 = vmatprep.subr.bf16.mxu0 %v905_v24 }
  0x1d   : > { %839 = vmatpush3.bf16.msra.mxu1 %v904_v23 }
  0x1e   : > { %840 = vmatprep.subr.bf16.mxu1 %v907_v26 }
  0x1f   : > { %819 = vmatpush3.bf16.msra.mxu0 %v906_v25 }
  0x20   : > { %820 = vmatprep.subr.bf16.mxu0 %v909_v28 }
  0x21   : > { %841 = vmatpush3.bf16.msra.mxu1 %v908_v27 }
  0x22   : > { %842 = vmatprep.subr.bf16.mxu1 %v911_v30 }
  0x23   : > { %821 = vmatpush3.bf16.msra.mxu0 %v910_v29 }
  0x24   : > { %850 = vmatprep.subr.bf16.mxu0 %v913_v36 }
  0x25   : > { %843 = vmatpush3.bf16.msra.mxu1 %v912_v33 }
  0x26   : > { %606 = vmatmul.mubr.bf16.vlgmr.msra.gmra.mrb[0].mxu0 %v176_v35 }
  0x27   : > { %851 = vmatpush3.bf16.msra.mxu0 %v914_v39  ;;  %685 = vmatprep.mubr.bf16.mxu0 %v181_v52 }
  0x28   : > { %646 = vmatmul.mubr.bf16.vlgmr.msra.gmra.mrb[0].mxu1 %v178_v41  ;;  %852 = vmatprep.subr.bf16.mxu0 %v915_v42 }
  0x2b   : > { %853 = vmatpush3.bf16.msra.mxu0 %v916_v43 }
  0x2c   : > { %854 = vmatprep.subr.bf16.mxu0 %v917_v44 }
  0x2f   : > { %855 = vmatpush3.bf16.msra.mxu0 %v918_v45 }
  0x30   : > { %856 = vmatprep.subr.bf16.mxu0 %v919_v46 }
  0x33   : > { %857 = vmatpush3.bf16.msra.mxu0 %v920_v47 }
  0x34   : > { %858 = vmatprep.subr.bf16.mxu0 %v921_v48 }
  0x37   : > { %859 = vmatpush3.bf16.msra.mxu0 %v922_v49 }
  0x38   : > { %860 = vmatprep.subr.bf16.mxu0 %v923_v50 }
  0x3b   : > { %861 = vmatpush3.bf16.msra.mxu0 %v924_v53 }
  0x3c   : > { %862 = vmatprep.subr.bf16.mxu0 %v925_v54 }
  0x3f   : > { %863 = vmatpush3.bf16.msra.mxu0 %v926_v55 }
  0x40   : > { %864 = vmatprep.subr.bf16.mxu0 %v927_v56 }
  0x43   : > { %865 = vmatpush3.bf16.msra.mxu0 %v928_v57 }
  0x46   : > { %686 = vmatmul.mubr.bf16.vlgmr.msra.gmra.mrb[4].mxu0 %v180_v59 }
  0xf9   : > { %v822_v60 = vpop.f32.mrb[0].mxu0 }
  0xfa   : > { %v823_v62 = vpop.f32.mrb[1].mxu0 }
  0xfb   : > { %v824_v63 = vadd.f32 %v823_v62, %v822_v60  ;;  %v825_v0 = vpop.f32.mrb[2].mxu0  ;;  %v844_v1 = vpop.f32.mrb[0].mxu1 }
  0xfc   : > { %v826_v2 = vpop.f32.mrb[3].mxu0  ;;  %v845_v4 = vpop.f32.mrb[1].mxu1 }
  0xfd   : > { %v608_v3 = vadd.f32 %v824_v63, %v755_v61  ;;  %v846_v5 = vadd.f32 %v845_v4, %v844_v1  ;;  %v847_v6 = vpop.f32.mrb[2].mxu1 }
  0xfe   : > { %v848_v7 = vpop.f32.mrb[3].mxu1 }
  0xff   : > { %v648_v8 = vadd.f32 %v846_v5, %v608_v3 }
 0x119   : > { %v866_v9 = vpop.f32.mrb[4].mxu0 }
 0x11a   : > { %v867_v10 = vpop.f32.mrb[5].mxu0 }
 0x11b   : > { %v868_v11 = vadd.f32 %v867_v10, %v866_v9  ;;  %v869_v12 = vpop.f32.mrb[6].mxu0 }
 0x11c   : > { %v870_v13 = vpop.f32.mrb[7].mxu0 }
 0x11d   : > { %v688_v14 = vadd.f32 %v868_v11, %v648_v8 }
 0x11f   : > { %694 = vst.msk [vmem:[%s168_s19] sm:$0xff] %vm693_vm0, %v688_v14 }
 0x120 PF: > { %s13_s12 = sadd.s32 1, %s935_s12  }
 0x121   : > { %p10_p4 = scmp.ge.s32.totalorder %s13_s12, 4  }
 0x123   :  { %12 = sbr.rel (!%p10_p4) target bundleno = 1 (0x1), region = 62 }

// kernel: wdisi_forward.7
= control target key start
LH: loop header
LB: loop body
LE: loop exit
PB: predicated region body
PF: predicated region fallthrough
CT: control target
= control target key end

     0   :  { %s1194_s24 = smov 0   ;;  %s1318_s0 = inlined_call_operand.vmem [shape: f32[4,5,32], index: 0, kind: input, shape index: {}]   ;;  %s1319_s1 = inlined_call_operand.vmem [shape: f32[1,32], index: 1, kind: input, shape index: {}]   ;;  %s1320_s2 = inlined_call_operand.vmem [shape: f32[1,32], index: 2, kind: input, shape index: {}]   ;;  %s1321_s3 = inlined_call_operand.vmem [shape: bf16[32,96], index: 3, kind: input, shape index: {}]   ;;  %s1322_s4 = inlined_call_operand.vmem [shape: f32[1,96], index: 4, kind: input, shape index: {}]   ;;  %s1323_s5 = inlined_call_operand.vmem [shape: bf16[32,32], index: 5, kind: input, shape index: {}]   ;;  %s1324_s6 = inlined_call_operand.vmem [shape: f32[1,32], index: 6, kind: input, shape index: {}]   ;;  %s1325_s7 = inlined_call_operand.vmem [shape: f32[4,5,32], index: 7, kind: output, shape index: {}]  }
   0x1 LB: > { %s969_s25 = sadd.s32 4294967295, %s1135_s24   ;;  %p973_p0 = scmp.ge.s32.totalorder %s1135_s24, 1  ;;  %s1135_s24 = sphi %s1194_s24, %s17_s24  }
   0x2   : > { %p236_p1 = scmp.lt.s32.totalorder %s1135_s24, 5 }
   0x4   : > { %p237_p2 = pnand %p973_p0, %p236_p1 }
   0x5   : > { %p266_p3 = scmp.lt.s32.totalorder (!%p237_p2), %s969_s25, 3  ;;  %vm276_vm0 = vcmask (!%p237_p2), 258048   ;;  %v1107_v7 = vld [vmem:[%s1321_s3] sm:$0xff] (!%p237_p2)   ;;  %v1137_v8 = vmov (!%p237_p2), 0.0   ;;  %vm1138_vm1 = vmmov (!%p237_p2), 0   ;;  %v1108_v9 = vld [vmem:[%s1321_s3 + $0x8] sm:$0xff] (!%p237_p2)  }
   0x6   : > { %240 = sbr.rel (%p237_p2) target bundleno = 1816 (0x718), region = 48  ;;  %1018 = vmatprep.subr.bf16.mxu0 (!%p237_p2), %v1137_v8  ;;  %1022 = vmatprep.mubr.msk.bf16.mxu0 (!%p237_p2), %vm1138_vm1, %v1137_v8  ;;  %v976_v14 = vld [vmem:[%s1319_s1] ss:$0 sm:$0xff] (!%p237_p2)  ;;  %vm331_vm2 = vcmask (!%p237_p2), 261120   ;;  %s1139_s17 = smov (!%p237_p2), 120   ;;  %vm379_vm3 = vcmask (!%p237_p2), 64512  }
   0x7   : > { %1019 = vmatpush3.bf16.msra.mxu0 (!%p237_p2), %v1107_v7  ;;  %1026 = vmatprep.subr.bf16.mxu1 (!%p237_p2), %v1137_v8  ;;  %v977_v16 = vld [vmem:[%s1320_s2] ss:$0 sm:$0xff] (!%p237_p2)  ;;  %s1140_s18 = smov (!%p237_p2), 96   ;;  %s1141_s19 = smov (!%p237_p2), 88   ;;  %vm427_vm4 = vcmask (!%p237_p2), 36864   ;;  %vm446_vm5 = vcmask (!%p237_p2), 1041408  }
   0x8   : > { %1020 = vmatprep.subr.bf16.mxu0 (!%p237_p2), %v1137_v8  ;;  %1028 = vmatprep.mubr.msk.bf16.mxu1 (!%p237_p2), %vm1138_vm1, %v1137_v8  ;;  %v978_v20 = vld [vmem:[%s1322_s4] ss:$0 sm:$0xff] (!%p237_p2)  ;;  %s1142_s20 = smov (!%p237_p2), 80   ;;  %s1143_s21 = smov (!%p237_p2), 112   ;;  %vm447_vm6 = vcmask (!%p237_p2), 1042432   ;;  %vm442_vm7 = vcmask (!%p237_p2), 39936  }
   0x9   : > { %s1144_s22 = smov (!%p237_p2), 72   ;;  %s1145_s23 = smov (!%p237_p2), 104   ;;  %vm493_vm8 = vcmask (!%p237_p2), 61440   ;;  %vm610_vm9 = vcmask (!%p237_p2), 127040   ;;  %vm727_vm10 = vcmask (!%p237_p2), 192640   ;;  %vm844_vm11 = vcmask (!%p237_p2), 258240  }
   0xa   : > { %s1146_s27 = smov (!%p237_p2), 56   ;;  %s1147_s28 = smov (!%p237_p2), 64  }
   0xb   : > { %1021 = vmatpush3.bf16.msra.mxu0 (!%p237_p2), %v1108_v9  ;;  %s1149_s30 = smov (!%p237_p2), 40   ;;  %s1151_s8 = smov (!%p237_p2), 8  }
   0xc   : > { %1032 = vmatprep.subr.bf16.mxu0 (!%p237_p2), %v1137_v8  ;;  %s1152_s13 = smov (!%p237_p2), 16   ;;  %s1153_s14 = smov (!%p237_p2), 24  }
   0xd   : > { %s1327_s25 = smov (!%p266_p3, %s969_s25), 3 }
   0xe   : > { %s974_s26 = sshll.u32 %s1327_s25, 3 }
   0xf   : > { %s269_s29 = scalar_lea.vmem %s1318_s0, %s974_s26 }
  0x10   : > { %v1210_v0 = vld [vmem:[%s269_s29] sm:$0x1f]  ;;  %s1148_s29 = smov 48  }
  0x11   : > { %v277_v1 = vsel %vm276_vm0, %v1210_v0, 0.0 }
  0x12   : > { %278 = vadd.xlane.f32.xlu0 %v277_v1 }
  0x9f   : > { %v279_v2 = vpop.xlane.xlu0 %278 }
  0xa0   : > { %v281_v3 = vmul.f32 0.03125, %v279_v2 }
  0xa2   : > { %v282_v4 = vsub.f32 %v1210_v0, %v281_v3 }
  0xa4   : > { %v283_v5 = vmul.f32 %v282_v4, %v282_v4 }
  0xa6   : > { %v284_v6 = vsel %vm276_vm0, %v283_v5, 0.0 }
  0xa7   : > { %285 = vadd.xlane.f32.xlu0 %v284_v6 }
 0x134   : > { %v286_v10 = vpop.xlane.xlu0 %285 }
 0x135   : > { %v287_v11 = vmul.f32 0.03125, %v286_v10 }
 0x137   : > { %v288_v12 = vadd.f32 1e-06, %v287_v11 }
 0x139   : > { %1111 = vrsqrt.f32 %v288_v12 }
 0x143   : > { %v1112_v13 = vpop.eup %1111 }
 0x144   : > { %v290_v15 = vmul.f32 %v1112_v13, %v282_v4 }
 0x146   : > { %v298_v17 = vmul.f32 %v976_v14, %v290_v15 }
 0x148   : > { %v306_v18 = vadd.f32 %v977_v16, %v298_v17 }
 0x14a   : > { %v307_v19 = vpack.c.bf16 %v306_v18, %v306_v18 }
 0x14c   : > { %1023 = vmatmul.mubr.msk.bf16.vlgmr.msra.gmra.mrb[0].mxu0 %vm331_vm2, %v307_v19 }
 0x14d   : > { %1034 = vmatprep.mubr.msk.bf16.mxu0 %vm1138_vm1, %v1137_v8 }
 0x21f   : > { %v369_v21 = vpop.f32.mrb[0].mxu0 }
 0x220   : > { %v370_v22 = vadd.f32 %v978_v20, %v369_v21  ;;  %v1024_v23 = vpop.f32.mrb[1].mxu0 }
 0x221   : > { %v372_v24 = vpop.f32.mrb[2].mxu0 }
 0x222   : > { %v1242_v25 = vpack.c.bf16 %v370_v22, %v370_v22  ;;  %v1025_v26 = vpop.f32.mrb[3].mxu0  ;;  %v1150_v22 = vmov 65535  }
 0x223   : > { %v448_v23 = vsel %vm446_vm5, 4294967295, %v1150_v22 }
 0x224   : > { %495 = vrot.lane.b32.xlu0 %v1242_v25, %s1139_s17  ;;  %377 = vrot.lane.b32.xlu1 %v1242_v25, %s1140_s18 }
 0x228   : > { %497 = vrot.lane.b32.xlu1 %v1242_v25, %s1141_s19  ;;  %s273_s19 = scalar_lea.vmem %s1325_s7, %s974_s26 }
 0x22c   : > { %614 = vrot.lane.b32.xlu1 %v1242_v25, %s1142_s20 }
 0x230   : > { %612 = vrot.lane.b32.xlu1 %v1242_v25, %s1143_s21 }
 0x234   : > { %731 = vrot.lane.b32.xlu1 %v1242_v25, %s1144_s22 }
 0x238   : > { %729 = vrot.lane.b32.xlu1 %v1242_v25, %s1145_s23 }
 0x296   : > { %v378_v27 = vpop.permute.xlu1 %377  ;;  %v496_v32 = vpop.permute.xlu0 %495 }
 0x297   : > { %v384_v28 = vsel %vm379_vm3, %v378_v27, 0  ;;  %v449_v27 = vsel %vm447_vm6, %v448_v23, 0 }
 0x298   : > { %1027 = vmatpush3.bf16.xpose.msra.mxu1 %v384_v28 }
 0x299   : > { %1038 = vmatprep.subr.bf16.mxu1 %v1137_v8 }
 0x29a   : > { %v498_v29 = vpop.permute.xlu1 %497 }
 0x29b   : > { %v503_v30 = vsel %vm379_vm3, %v498_v29, 0 }
 0x29e   : > { %v615_v31 = vpop.permute.xlu1 %614 }
 0x29f   : > { %1029 = vmatmul.mubr.msk.bf16.vlgmr.msra.gmra.mrb[0].mxu1 %vm379_vm3, %v1242_v25  ;;  %v620_v34 = vsel %vm379_vm3, %v615_v31, 0 }
 0x2a0   : > { %1039 = vmatpush3.bf16.xpose.msra.mxu1 %v503_v30  ;;  %1040 = vmatprep.mubr.msk.bf16.mxu1 %vm1138_vm1, %v1137_v8 }
 0x2a1   : > { %1050 = vmatprep.subr.bf16.mxu1 %v1137_v8 }
 0x2a2   : > { %v613_v33 = vpop.permute.xlu1 %612 }
 0x2a6   : > { %v732_v35 = vpop.permute.xlu1 %731 }
 0x2a7   : > { %1041 = vmatmul.mubr.msk.bf16.vlgmr.msra.gmra.mrb[4].mxu1 %vm379_vm3, %v496_v32  ;;  %v737_v36 = vsel %vm379_vm3, %v732_v35, 0 }
 0x2a8   : > { %1051 = vmatpush3.bf16.xpose.msra.mxu1 %v620_v34  ;;  %1052 = vmatprep.mubr.msk.bf16.mxu1 %vm1138_vm1, %v1137_v8 }
 0x2a9   : > { %1062 = vmatprep.subr.bf16.mxu1 %v1137_v8 }
 0x2aa   : > { %v730_v37 = vpop.permute.xlu1 %729 }
 0x2af   : > { %1053 = vmatmul.mubr.msk.bf16.vlgmr.msra.gmra.mrb[8].mxu1 %vm379_vm3, %v613_v33 }
 0x2b0   : > { %1063 = vmatpush3.bf16.xpose.msra.mxu1 %v737_v36  ;;  %1064 = vmatprep.mubr.msk.bf16.mxu1 %vm1138_vm1, %v1137_v8 }
 0x2b1   : > { %1074 = vmatprep.subr.bf16.mxu1 %v1137_v8 }
 0x2b7   : > { %1065 = vmatmul.mubr.msk.bf16.vlgmr.msra.gmra.mrb[12].mxu1 %vm379_vm3, %v730_v37 }
 0x2b8   : > { %1078 = vmatprep.mubr.msk.bf16.mxu1 %vm1138_vm1, %v1137_v8 }
 0x372   : > { %v420_v38 = vpop.f32.mrb[0].mxu1 }
 0x373   : > { %v426_v39 = vmul.f32 0.35355338, %v420_v38  ;;  %v1030_v40 = vpop.f32.mrb[1].mxu1 }
 0x374   : > { %v423_v41 = vpop.f32.mrb[2].mxu1 }
 0x375   : > { %v1031_v42 = vpop.f32.mrb[3].mxu1  ;;  %v428_v43 = vsel %vm427_vm4, %v426_v39, -inf }
 0x376   : > { %429 = vmax.xlane.f32.xlu1 %v428_v43 }
 0x37a   : > { %v539_v44 = vpop.f32.mrb[4].mxu1 }
 0x37b   : > { %v545_v45 = vmul.f32 0.35355338, %v539_v44  ;;  %v1042_v46 = vpop.f32.mrb[5].mxu1 }
 0x37c   : > { %v542_v47 = vpop.f32.mrb[6].mxu1 }
 0x37d   : > { %v1043_v48 = vpop.f32.mrb[7].mxu1  ;;  %v546_v49 = vsel %vm427_vm4, %v545_v45, -inf }
 0x37e   : > { %547 = vmax.xlane.f32.xlu0 %v546_v49 }
 0x382   : > { %v656_v50 = vpop.f32.mrb[8].mxu1 }
 0x383   : > { %v662_v51 = vmul.f32 0.35355338, %v656_v50  ;;  %v1054_v52 = vpop.f32.mrb[9].mxu1 }
 0x384   : > { %v659_v53 = vpop.f32.mrb[10].mxu1 }
 0x385   : > { %v1055_v54 = vpop.f32.mrb[11].mxu1  ;;  %v663_v55 = vsel %vm427_vm4, %v662_v51, -inf }
 0x386   : > { %664 = vmax.xlane.f32.xlu1 %v663_v55  ;;  %v1109_v55 = vld [vmem:[%s1323_s5] sm:$0xff]  }
 0x387   : > { %1075 = vmatpush3.bf16.msra.mxu1 %v1109_v55 }
 0x388   : > { %1076 = vmatprep.subr.bf16.mxu1 %v1137_v8 }
 0x38a   : > { %v773_v56 = vpop.f32.mrb[12].mxu1 }
 0x38b   : > { %v779_v57 = vmul.f32 0.35355338, %v773_v56  ;;  %v1066_v58 = vpop.f32.mrb[13].mxu1  ;;  %v1110_v56 = vld [vmem:[%s1323_s5 + $0x8] sm:$0xff]  }
 0x38c   : > { %v776_v59 = vpop.f32.mrb[14].mxu1  ;;  %1077 = vmatpush3.bf16.msra.mxu1 %v1110_v56 }
 0x38d   : > { %v1067_v60 = vpop.f32.mrb[15].mxu1  ;;  %v780_v61 = vsel %vm427_vm4, %v779_v57, -inf }
 0x38e   : > { %781 = vmax.xlane.f32.xlu0 %v780_v61 }
 0x403   : > { %v430_v62 = vpop.xlane.xlu1 %429 }
 0x404   : > { %v431_v63 = vsub.f32 %v426_v39, %v430_v62 }
 0x406   : > { %v432_v1 = vmul.f32 1.442695, %v431_v63 }
 0x408   : > { %1113 = vpow2.f32 %v432_v1 }
 0x40b   : > { %v548_v2 = vpop.xlane.xlu0 %547 }
 0x40c   : > { %v549_v3 = vsub.f32 %v545_v45, %v548_v2 }
 0x40e   : > { %v550_v4 = vmul.f32 1.442695, %v549_v3 }
 0x410   : > { %1115 = vpow2.f32 %v550_v4 }
 0x412   : > { %v1114_v5 = vpop.eup %1113 }
 0x413   : > { %v434_v6 = vsel %vm427_vm4, %v1114_v5, 0.0  ;;  %v665_v10 = vpop.xlane.xlu1 %664 }
 0x414   : > { %435 = vadd.xlane.f32.xlu1 %v434_v6  ;;  %v666_v11 = vsub.f32 %v662_v51, %v665_v10  ;;  %v990_v6 = vld [vmem:[%s1324_s6] ss:$0 sm:$0xff] }
 0x416   : > { %v667_v13 = vmul.f32 1.442695, %v666_v11 }
 0x418   : > { %1117 = vpow2.f32 %v667_v13 }
 0x41a   : > { %v1116_v7 = vpop.eup %1115 }
 0x41b   : > { %v552_v9 = vsel %vm427_vm4, %v1116_v7, 0.0  ;;  %v782_v12 = vpop.xlane.xlu0 %781 }
 0x41c   : > { %553 = vadd.xlane.f32.xlu0 %v552_v9  ;;  %v783_v14 = vsub.f32 %v779_v57, %v782_v12 }
 0x41e   : > { %v784_v15 = vmul.f32 1.442695, %v783_v14 }
 0x420   : > { %1119 = vpow2.f32 %v784_v15 }
 0x422   : > { %v1118_v16 = vpop.eup %1117 }
 0x423   : > { %v669_v17 = vsel %vm427_vm4, %v1118_v16, 0.0 }
 0x425   : > { %558 = vrot.lane.b32.xlu1 %v1242_v25, %s1146_s27 }
 0x42a   : > { %v1120_v18 = vpop.eup %1119 }
 0x42b   : > { %v786_v19 = vsel %vm427_vm4, %v1120_v18, 0.0 }
 0x432   : > { %440 = vrot.lane.b32.xlu0 %v1242_v25, %s1147_s28 }
 0x436   : > { %675 = vrot.lane.b32.xlu0 %v1242_v25, %s1148_s29 }
 0x449   : > { %670 = vadd.xlane.f32.xlu1 %v669_v17 }
 0x44d   : > { %787 = vadd.xlane.f32.xlu1 %v786_v19 }
 0x45e   : > { %792 = vrot.lane.b32.xlu1 %v1242_v25, %s1149_s30 }
 0x4a1   : > { %v436_v20 = vpop.xlane.xlu1 %435 }
 0x4a2   : > { %1121 = vrcp.f32 %v436_v20 }
 0x4a5   : > { %v559_v30 = vpop.permute.xlu1 %558 }
 0x4a6   : > { %v564_v25 = vand.u32 %v559_v30, %v449_v27 }
 0x4a9   : > { %v554_v21 = vpop.xlane.xlu0 %553 }
 0x4aa   : > { %1123 = vrcp.f32 %v554_v21 }
 0x4ac   : > { %v1122_v24 = vpop.eup %1121 }
 0x4ad   : > { %v438_v26 = vmul.f32 %v1122_v24, %v1114_v5  ;;  %v441_v28 = vpop.permute.xlu0 %440 }
 0x4ae   : > { %v451_v29 = vand.u32 %v449_v27, %v441_v28 }
 0x4af   : > { %v439_v31 = vpack.c.bf16 %v438_v26, %v438_v26 }
 0x4b0   : > { %1033 = vmatpush3.bf16.msra.mxu0 %v451_v29 }
 0x4b1   : > { %1044 = vmatprep.subr.bf16.mxu0 %v1137_v8  ;;  %v676_v34 = vpop.permute.xlu0 %675 }
 0x4b2   : > { %v681_v36 = vand.u32 %v676_v34, %v449_v27 }
 0x4b3   : > { %1035 = vmatmul.mubr.msk.bf16.vlgmr.msra.gmra.mrb[4].mxu0 %vm442_vm7, %v439_v31 }
 0x4b4   : > { %v1124_v32 = vpop.eup %1123  ;;  %1045 = vmatpush3.bf16.msra.mxu0 %v564_v25  ;;  %1046 = vmatprep.mubr.msk.bf16.mxu0 %vm1138_vm1, %v1137_v8 }
 0x4b5   : > { %v556_v33 = vmul.f32 %v1124_v32, %v1116_v7  ;;  %1056 = vmatprep.subr.bf16.mxu0 %v1137_v8 }
 0x4b7   : > { %v557_v35 = vpack.c.bf16 %v556_v33, %v556_v33 }
 0x4bb   : > { %1047 = vmatmul.mubr.msk.bf16.vlgmr.msra.gmra.mrb[8].mxu0 %vm442_vm7, %v557_v35 }
 0x4bc   : > { %1057 = vmatpush3.bf16.msra.mxu0 %v681_v36  ;;  %1058 = vmatprep.mubr.msk.bf16.mxu0 %vm1138_vm1, %v1137_v8 }
 0x4bd   : > { %1068 = vmatprep.subr.bf16.mxu0 %v1137_v8 }
 0x4d6   : > { %v671_v37 = vpop.xlane.xlu1 %670 }
 0x4d7   : > { %1125 = vrcp.f32 %v671_v37 }
 0x4da   : > { %v788_v38 = vpop.xlane.xlu1 %787 }
 0x4db   : > { %1127 = vrcp.f32 %v788_v38 }
 0x4de   : > { %v793_v41 = vpop.permute.xlu1 %792 }
 0x4df   : > { %v798_v44 = vand.u32 %v793_v41, %v449_v27 }
 0x4e1   : > { %v1126_v39 = vpop.eup %1125 }
 0x4e2   : > { %v673_v40 = vmul.f32 %v1126_v39, %v1118_v16 }
 0x4e4   : > { %v674_v42 = vpack.c.bf16 %v673_v40, %v673_v40 }
 0x4e5   : > { %v1128_v43 = vpop.eup %1127 }
 0x4e6   : > { %1059 = vmatmul.mubr.msk.bf16.vlgmr.msra.gmra.mrb[12].mxu0 %vm442_vm7, %v674_v42  ;;  %v790_v45 = vmul.f32 %v1128_v43, %v1120_v18 }
 0x4e7   : > { %1069 = vmatpush3.bf16.msra.mxu0 %v798_v44  ;;  %1070 = vmatprep.mubr.msk.bf16.mxu0 %vm1138_vm1, %v1137_v8 }
 0x4e8   : > { %v791_v46 = vpack.c.bf16 %v790_v45, %v790_v45 }
 0x4ee   : > { %1071 = vmatmul.mubr.msk.bf16.vlgmr.msra.gmra.mrb[16].mxu0 %vm442_vm7, %v791_v46 }
 0x586   : > { %v487_v47 = vpop.f32.mrb[4].mxu0 }
 0x587   : > { %494 = vst.msk [vmem:[#allocation2] sm:$0x1f] %vm493_vm8, %v487_v47  ;;  %v1036_v48 = vpop.f32.mrb[5].mxu0 }
 0x588   : > { %v490_v49 = vpop.f32.mrb[6].mxu0 }
 0x589   : > { %v1037_v50 = vpop.f32.mrb[7].mxu0 }
 0x58e   : > { %v600_v51 = vpop.f32.mrb[8].mxu0 }
 0x58f   : > { %607 = vrot.lane.b32.xlu0 %v600_v51, %s1151_s8  ;;  %v1048_v52 = vpop.f32.mrb[9].mxu0 }
 0x590   : > { %v603_v53 = vpop.f32.mrb[10].mxu0 }
 0x591   : > { %v1049_v54 = vpop.f32.mrb[11].mxu0 }
 0x5b9   : > { %v717_v57 = vpop.f32.mrb[12].mxu0 }
 0x5ba   : > { %724 = vrot.lane.b32.xlu1 %v717_v57, %s1152_s13  ;;  %v1060_v58 = vpop.f32.mrb[13].mxu0 }
 0x5bb   : > { %v720_v59 = vpop.f32.mrb[14].mxu0 }
 0x5bc   : > { %v1061_v60 = vpop.f32.mrb[15].mxu0 }
 0x5c1   : > { %v834_v61 = vpop.f32.mrb[16].mxu0 }
 0x5c2   : > { %841 = vrot.lane.b32.xlu0 %v834_v61, %s1153_s14  ;;  %v1072_v62 = vpop.f32.mrb[17].mxu0 }
 0x5c3   : > { %v837_v63 = vpop.f32.mrb[18].mxu0 }
 0x5c4   : > { %v1073_v1 = vpop.f32.mrb[19].mxu0 }
 0x601   : > { %v608_v2 = vpop.permute.xlu0 %607 }
 0x602   : > { %611 = vst.msk [vmem:[#allocation2] sm:$0x1f] %vm610_vm9, %v608_v2 }
 0x62c   : > { %v725_v3 = vpop.permute.xlu1 %724 }
 0x62d   : > { %728 = vst.msk [vmem:[#allocation2] sm:$0x1f] %vm727_vm10, %v725_v3 }
 0x634   : > { %v842_v8 = vpop.permute.xlu0 %841 }
 0x635   : > { %845 = vst.msk [vmem:[#allocation2] sm:$0x1f] %vm844_vm11, %v842_v8 }
 0x63c   : > { %v846_v4 = vld [vmem:[#allocation2] sm:$0x1f] }
 0x63d   : > { %v847_v5 = vpack.c.bf16 %v846_v4, %v846_v4 }
 0x63f   : > { %1079 = vmatmul.mubr.msk.bf16.vlgmr.msra.gmra.mrb[16].mxu1 %vm331_vm2, %v847_v5 }
 0x712   : > { %v908_v7 = vpop.f32.mrb[16].mxu1 }
 0x713   : > { %v909_v9 = vadd.f32 %v990_v6, %v908_v7  ;;  %v1080_v10 = vpop.f32.mrb[17].mxu1 }
 0x714   : > { %v911_v11 = vpop.f32.mrb[18].mxu1 }
 0x715   : > { %v914_v12 = vadd.f32 %v909_v9, %v1210_v0  ;;  %v1081_v13 = vpop.f32.mrb[19].mxu1 }
 0x717   : > { %915 = vst.msk [vmem:[%s273_s19] sm:$0x1f] %vm276_vm0, %v914_v12 }
 0x718 PF: > { %s17_s24 = sadd.s32 1, %s1135_s24  }
 0x719   : > { %p14_p4 = scmp.ge.s32.totalorder %s17_s24, 6  }
 0x71b   :  { %16 = sbr.rel (!%p14_p4) target bundleno = 1 (0x1), region = 78 }

// kernel: wdisi_forward.11
= control target key start
LH: loop header
LB: loop body
LE: loop exit
PB: predicated region body
PF: predicated region fallthrough
CT: control target
= control target key end

     0   :  { %s1261_s24 = smov 0   ;;  %s1401_s0 = inlined_call_operand.vmem [shape: f32[2,10,32], index: 0, kind: input, shape index: {}]   ;;  %s1402_s1 = inlined_call_operand.vmem [shape: f32[1,32], index: 1, kind: input, shape index: {}]   ;;  %s1403_s2 = inlined_call_operand.vmem [shape: f32[1,32], index: 2, kind: input, shape index: {}]   ;;  %s1404_s3 = inlined_call_operand.vmem [shape: bf16[32,96], index: 3, kind: input, shape index: {}]   ;;  %s1405_s4 = inlined_call_operand.vmem [shape: f32[1,96], index: 4, kind: input, shape index: {}]   ;;  %s1406_s5 = inlined_call_operand.vmem [shape: bf16[32,32], index: 5, kind: input, shape index: {}]   ;;  %s1407_s6 = inlined_call_operand.vmem [shape: f32[1,32], index: 6, kind: input, shape index: {}]   ;;  %s1408_s7 = inlined_call_operand.vmem [shape: f32[2,10,32], index: 7, kind: output, shape index: {}]  }
   0x1 LB: > { %s1022_s1 = sadd.s32 4294967295, %s1203_s24   ;;  %p1026_p0 = scmp.ge.s32.totalorder %s1203_s24, 1  ;;  %s1203_s24 = sphi %s1261_s24, %s17_s24  }
   0x2   : > { %p237_p1 = scmp.lt.s32.totalorder %s1203_s24, 3 }
   0x4   : > { %p238_p2 = pnand %p1026_p0, %p237_p1 }
   0x5   : > { %v1161_v0 = vld [vmem:[%s1404_s3] sm:$0xff] (!%p238_p2)   ;;  %v1205_v1 = vmov (!%p238_p2), 0.0   ;;  %v1162_v2 = vld [vmem:[%s1404_s3 + $0x8] sm:$0xff] (!%p238_p2)   ;;  %vm1206_vm0 = vmmov (!%p238_p2), 0   ;;  %p269_p3 = scmp.lt.s32.totalorder (!%p238_p2), %s1022_s1, 1  ;;  %vm306_vm1 = vcmask (!%p238_p2), 261120  }
   0x6   : > { %241 = sbr.rel (%p238_p2) target bundleno = 1517 (0x5ed), region = 48  ;;  %1073 = vmatprep.subr.bf16.mxu0 (!%p238_p2), %v1205_v1  ;;  %1081 = vmatprep.subr.bf16.mxu1 (!%p238_p2), %v1205_v1  ;;  %v1031_v6 = vld [vmem:[%s1405_s4] ss:$0 sm:$0xff] (!%p238_p2)  ;;  %s1207_s11 = smov (!%p238_p2), 120   ;;  %vm355_vm2 = vcmask (!%p238_p2), 64512   ;;  %vm405_vm3 = vcmask (!%p238_p2), 80896  }
   0x7   : > { %1074 = vmatpush3.bf16.msra.mxu0 (!%p238_p2), %v1161_v0  ;;  %1077 = vmatprep.mubr.msk.bf16.mxu0 (!%p238_p2), %vm1206_vm0, %v1205_v1  ;;  %s1208_s12 = smov (!%p238_p2), 96   ;;  %s1209_s13 = smov (!%p238_p2), 80   ;;  %vm409_vm4 = vcmask (!%p238_p2), 74752   ;;  %vm435_vm5 = vcmask (!%p238_p2), 1044480   ;;  %vm481_vm6 = vcmask (!%p238_p2), 58368   ;;  %vm616_vm7 = vcmask (!%p238_p2), 130112  }
   0x8   : > { %1075 = vmatprep.subr.bf16.mxu0 (!%p238_p2), %v1205_v1  ;;  %1083 = vmatprep.mubr.msk.bf16.mxu1 (!%p238_p2), %vm1206_vm0, %v1205_v1  ;;  %s1210_s14 = smov (!%p238_p2), 88   ;;  %s1211_s15 = smov (!%p238_p2), 72   ;;  %vm618_vm8 = vcmask (!%p238_p2), 123968   ;;  %vm753_vm9 = vcmask (!%p238_p2), 195712   ;;  %vm755_vm10 = vcmask (!%p238_p2), 189568   ;;  %vm890_vm11 = vcmask (!%p238_p2), 261312  }
   0x9   : > { %s1212_s16 = smov (!%p238_p2), 112   ;;  %s1213_s17 = smov (!%p238_p2), 104   ;;  %vm892_vm12 = vcmask (!%p238_p2), 255168   ;;  %vm965_vm13 = vcmask (!%p238_p2), 254976  }
   0xa   : > { %s1214_s18 = smov (!%p238_p2), 56   ;;  %s1215_s19 = smov (!%p238_p2), 64  }
   0xb   : > { %1076 = vmatpush3.bf16.msra.mxu0 (!%p238_p2), %v1162_v2  ;;  %s1216_s20 = smov (!%p238_p2), 48   ;;  %s1217_s21 = smov (!%p238_p2), 40  }
   0xc   : > { %1087 = vmatprep.subr.bf16.mxu0 (!%p238_p2), %v1205_v1  ;;  %s1218_s22 = smov (!%p238_p2), 8   ;;  %s1219_s27 = smov (!%p238_p2), 16  }
   0xd   : > { %s1410_s1 = smov (!%p269_p3, %s1022_s1), 1  ;;  %s1220_s29 = smov 24  }
   0xe   : > { %s1049_s28 = sshll.u32 %s1410_s1, 4 }
   0xf   : > { %s273_s8 = scalar_lea.vmem %s1401_s0, %s1049_s28 }
  0x10   : > { %v280_v3 = vld [vmem:[%s273_s8] sm:$0xff]  ;;  %v281_v4 = vld [vmem:[%s273_s8 + $0x8] sm:$0x3] }
  0x11   : > { %v282_v5 = vpack.c.bf16 %v281_v4, %v280_v3 }
  0x13   : > { %1078 = vmatmul.mubr.msk.bf16.vlgmr.msra.gmra.mrb[0].mxu0 %vm306_vm1, %v282_v5 }
  0x14   : > { %1089 = vmatprep.mubr.msk.bf16.mxu0 %vm1206_vm0, %v1205_v1 }
  0xe6   : > { %v344_v7 = vpop.f32.mrb[0].mxu0 }
  0xe7   : > { %v1079_v8 = vpop.f32.mrb[1].mxu0  ;;  %v345_v10 = vadd.f32 %v1031_v6, %v344_v7 }
  0xe8   : > { %v347_v9 = vpop.f32.mrb[2].mxu0 }
  0xe9   : > { %v348_v11 = vadd.f32 %v1031_v6, %v347_v9  ;;  %v1080_v12 = vpop.f32.mrb[3].mxu0 }
  0xeb   : > { %v1297_v13 = vpack.c.bf16 %v348_v11, %v345_v10 }
  0xed   : > { %483 = vrot.lane.b32.xlu1 %v1297_v13, %s1207_s11  ;;  %353 = vrot.lane.b32.xlu0 %v1297_v13, %s1208_s12  ;;  %s278_s11 = scalar_lea.vmem %s1408_s7, %s1049_s28 }
  0xf1   : > { %622 = vrot.lane.b32.xlu1 %v1297_v13, %s1209_s13  ;;  %485 = vrot.lane.b32.xlu0 %v1297_v13, %s1210_s14 }
  0xf5   : > { %759 = vrot.lane.b32.xlu1 %v1297_v13, %s1211_s15  ;;  %620 = vrot.lane.b32.xlu0 %v1297_v13, %s1212_s16 }
  0xf9   : > { %757 = vrot.lane.b32.xlu0 %v1297_v13, %s1213_s17 }
 0x15f   : > { %v354_v14 = vpop.permute.xlu0 %353  ;;  %v484_v17 = vpop.permute.xlu1 %483 }
 0x160   : > { %v360_v15 = vsel %vm355_vm2, %v354_v14, 0 }
 0x161   : > { %1082 = vmatpush3.bf16.xpose.msra.mxu1 %v360_v15 }
 0x162   : > { %1093 = vmatprep.subr.bf16.mxu1 %v1205_v1 }
 0x163   : > { %v486_v16 = vpop.permute.xlu0 %485  ;;  %v623_v19 = vpop.permute.xlu1 %622 }
 0x164   : > { %v491_v18 = vsel %vm355_vm2, %v486_v16, 0  ;;  %v628_v20 = vsel %vm355_vm2, %v623_v19, 0 }
 0x167   : > { %v760_v21 = vpop.permute.xlu1 %759  ;;  %v621_v22 = vpop.permute.xlu0 %620 }
 0x168   : > { %1084 = vmatmul.mubr.msk.bf16.vlgmr.msra.gmra.mrb[0].mxu1 %vm355_vm2, %v1297_v13  ;;  %v765_v23 = vsel %vm355_vm2, %v760_v21, 0 }
 0x169   : > { %1094 = vmatpush3.bf16.xpose.msra.mxu1 %v491_v18  ;;  %1095 = vmatprep.mubr.msk.bf16.mxu1 %vm1206_vm0, %v1205_v1 }
 0x16a   : > { %1105 = vmatprep.subr.bf16.mxu1 %v1205_v1 }
 0x16b   : > { %v758_v24 = vpop.permute.xlu0 %757 }
 0x170   : > { %1096 = vmatmul.mubr.msk.bf16.vlgmr.msra.gmra.mrb[4].mxu1 %vm355_vm2, %v484_v17 }
 0x171   : > { %1106 = vmatpush3.bf16.xpose.msra.mxu1 %v628_v20  ;;  %1107 = vmatprep.mubr.msk.bf16.mxu1 %vm1206_vm0, %v1205_v1 }
 0x172   : > { %1117 = vmatprep.subr.bf16.mxu1 %v1205_v1 }
 0x178   : > { %1108 = vmatmul.mubr.msk.bf16.vlgmr.msra.gmra.mrb[8].mxu1 %vm355_vm2, %v621_v22 }
 0x179   : > { %1118 = vmatpush3.bf16.xpose.msra.mxu1 %v765_v23  ;;  %1119 = vmatprep.mubr.msk.bf16.mxu1 %vm1206_vm0, %v1205_v1 }
 0x17a   : > { %1129 = vmatprep.subr.bf16.mxu1 %v1205_v1 }
 0x180   : > { %1120 = vmatmul.mubr.msk.bf16.vlgmr.msra.gmra.mrb[12].mxu1 %vm355_vm2, %v758_v24 }
 0x181   : > { %1133 = vmatprep.mubr.msk.bf16.mxu1 %vm1206_vm0, %v1205_v1 }
 0x23b   : > { %v396_v25 = vpop.f32.mrb[0].mxu1 }
 0x23c   : > { %v403_v26 = vmul.f32 0.35355338, %v396_v25  ;;  %v1085_v27 = vpop.f32.mrb[1].mxu1 }
 0x23d   : > { %v399_v28 = vpop.f32.mrb[2].mxu1 }
 0x23e   : > { %v404_v29 = vmul.f32 0.35355338, %v399_v28  ;;  %v1086_v30 = vpop.f32.mrb[3].mxu1  ;;  %v406_v31 = vsel %vm405_vm3, %v403_v26, -inf }
 0x23f   : > { %407 = vmax.xlane.f32.xlu1 %v406_v31 }
 0x240   : > { %v410_v32 = vsel %vm409_vm4, %v404_v29, -inf }
 0x241   : > { %411 = vmax.xlane.f32.xlu0 %v410_v32 }
 0x243   : > { %v527_v33 = vpop.f32.mrb[4].mxu1 }
 0x244   : > { %v534_v34 = vmul.f32 0.35355338, %v527_v33  ;;  %v1097_v35 = vpop.f32.mrb[5].mxu1 }
 0x245   : > { %v530_v36 = vpop.f32.mrb[6].mxu1 }
 0x246   : > { %v535_v37 = vmul.f32 0.35355338, %v530_v36  ;;  %v1098_v38 = vpop.f32.mrb[7].mxu1  ;;  %v536_v39 = vsel %vm405_vm3, %v534_v34, -inf }
 0x247   : > { %537 = vmax.xlane.f32.xlu0 %v536_v39 }
 0x248   : > { %v539_v40 = vsel %vm409_vm4, %v535_v37, -inf }
 0x249   : > { %540 = vmax.xlane.f32.xlu1 %v539_v40 }
 0x24b   : > { %v664_v41 = vpop.f32.mrb[8].mxu1 }
 0x24c   : > { %v671_v42 = vmul.f32 0.35355338, %v664_v41  ;;  %v1109_v43 = vpop.f32.mrb[9].mxu1 }
 0x24d   : > { %v667_v44 = vpop.f32.mrb[10].mxu1 }
 0x24e   : > { %v672_v45 = vmul.f32 0.35355338, %v667_v44  ;;  %v1110_v46 = vpop.f32.mrb[11].mxu1  ;;  %v673_v47 = vsel %vm405_vm3, %v671_v42, -inf }
 0x24f   : > { %674 = vmax.xlane.f32.xlu0 %v673_v47 }
 0x250   : > { %v676_v48 = vsel %vm409_vm4, %v672_v45, -inf }
 0x251   : > { %677 = vmax.xlane.f32.xlu1 %v676_v48 }
 0x253   : > { %v801_v49 = vpop.f32.mrb[12].mxu1 }
 0x254   : > { %v808_v50 = vmul.f32 0.35355338, %v801_v49  ;;  %v1121_v51 = vpop.f32.mrb[13].mxu1 }
 0x255   : > { %v804_v52 = vpop.f32.mrb[14].mxu1 }
 0x256   : > { %v809_v53 = vmul.f32 0.35355338, %v804_v52  ;;  %v1122_v54 = vpop.f32.mrb[15].mxu1  ;;  %v810_v55 = vsel %vm405_vm3, %v808_v50, -inf }
 0x257   : > { %811 = vmax.xlane.f32.xlu0 %v810_v55 }
 0x258   : > { %v813_v56 = vsel %vm409_vm4, %v809_v53, -inf }
 0x259   : > { %814 = vmax.xlane.f32.xlu1 %v813_v56 }
 0x2cc   : > { %v408_v57 = vpop.xlane.xlu1 %407 }
 0x2cd   : > { %v413_v58 = vsub.f32 %v403_v26, %v408_v57 }
 0x2ce   : > { %v412_v59 = vpop.xlane.xlu0 %411 }
 0x2cf   : > { %v415_v60 = vmul.f32 1.442695, %v413_v58  ;;  %v414_v61 = vsub.f32 %v404_v29, %v412_v59 }
 0x2d1   : > { %1165 = vpow2.f32 %v415_v60  ;;  %v417_v62 = vmul.f32 1.442695, %v414_v61 }
 0x2d3   : > { %1167 = vpow2.f32 %v417_v62 }
 0x2d4   : > { %v538_v63 = vpop.xlane.xlu0 %537 }
 0x2d5   : > { %v542_v0 = vsub.f32 %v534_v34, %v538_v63 }
 0x2d6   : > { %v541_v9 = vpop.xlane.xlu1 %540 }
 0x2d7   : > { %v544_v2 = vmul.f32 1.442695, %v542_v0  ;;  %v543_v10 = vsub.f32 %v535_v37, %v541_v9 }
 0x2d9   : > { %1169 = vpow2.f32 %v544_v2  ;;  %v546_v14 = vmul.f32 1.442695, %v543_v10 }
 0x2db   : > { %v1166_v3 = vpop.eup %1165  ;;  %1171 = vpow2.f32 %v546_v14 }
 0x2dc   : > { %v419_v4 = vsel %vm405_vm3, %v1166_v3, 0.0  ;;  %v675_v12 = vpop.xlane.xlu0 %674 }
 0x2dd   : > { %v1168_v5 = vpop.eup %1167  ;;  %420 = vadd.xlane.f32.xlu0 %v419_v4  ;;  %v679_v17 = vsub.f32 %v671_v42, %v675_v12 }
 0x2de   : > { %v422_v6 = vsel %vm409_vm4, %v1168_v5, 0.0  ;;  %v678_v11 = vpop.xlane.xlu1 %677 }
 0x2df   : > { %423 = vadd.xlane.f32.xlu1 %v422_v6  ;;  %v680_v15 = vsub.f32 %v672_v45, %v678_v11  ;;  %v681_v21 = vmul.f32 1.442695, %v679_v17 }
 0x2e1   : > { %v683_v19 = vmul.f32 1.442695, %v680_v15 }
 0x2e3   : > { %v1337_v7 = vpop.eup %1169  ;;  %1173 = vpow2.f32 %v683_v19 }
 0x2e4   : > { %v548_v8 = vsel %vm405_vm3, %v1337_v7, 0.0  ;;  %v812_v18 = vpop.xlane.xlu0 %811  ;;  %1175 = vpow2.f32 %v681_v21 }
 0x2e5   : > { %549 = vadd.xlane.f32.xlu0 %v548_v8  ;;  %v816_v22 = vsub.f32 %v808_v50, %v812_v18  ;;  %v1172_v25 = vpop.eup %1171  ;;  %v1164_v18 = vld [vmem:[%s1406_s5 + $0x8] sm:$0xff]  }
 0x2e6   : > { %v815_v16 = vpop.xlane.xlu1 %814  ;;  %v551_v26 = vsel %vm409_vm4, %v1172_v25, 0.0 }
 0x2e7   : > { %v817_v20 = vsub.f32 %v809_v53, %v815_v16  ;;  %v818_v24 = vmul.f32 1.442695, %v816_v22  ;;  %v1163_v16 = vld [vmem:[%s1406_s5] sm:$0xff]  }
 0x2e8   : > { %1130 = vmatpush3.bf16.msra.mxu1 %v1163_v16 }
 0x2e9   : > { %v820_v23 = vmul.f32 1.442695, %v817_v20  ;;  %1131 = vmatprep.subr.bf16.mxu1 %v1205_v1 }
 0x2eb   : > { %1177 = vpow2.f32 %v820_v23 }
 0x2ec   : > { %1179 = vpow2.f32 %v818_v24  ;;  %1132 = vmatpush3.bf16.msra.mxu1 %v1164_v18 }
 0x2ed   : > { %v1344_v27 = vpop.eup %1173 }
 0x2ee   : > { %v1176_v28 = vpop.eup %1175  ;;  %v688_v29 = vsel %vm409_vm4, %v1344_v27, 0.0 }
 0x2ef   : > { %v685_v31 = vsel %vm405_vm3, %v1176_v28, 0.0 }
 0x2f0   : > { %559 = vrot.lane.b32.xlu1 %v1297_v13, %s1214_s18 }
 0x2f5   : > { %v1348_v30 = vpop.eup %1177 }
 0x2f6   : > { %v1351_v32 = vpop.eup %1179  ;;  %v825_v33 = vsel %vm409_vm4, %v1348_v30, 0.0 }
 0x2f7   : > { %v822_v34 = vsel %vm405_vm3, %v1351_v32, 0.0 }
 0x2fb   : > { %430 = vrot.lane.b32.xlu0 %v1297_v13, %s1215_s19 }
 0x314   : > { %552 = vadd.xlane.f32.xlu1 %v551_v26 }
 0x318   : > { %689 = vadd.xlane.f32.xlu1 %v688_v29 }
 0x31a   : > { %686 = vadd.xlane.f32.xlu0 %v685_v31 }
 0x31c   : > { %826 = vadd.xlane.f32.xlu1 %v825_v33 }
 0x31e   : > { %823 = vadd.xlane.f32.xlu0 %v822_v34  ;;  %v1043_v34 = vld [vmem:[%s1407_s6] ss:$0 sm:$0xff] }
 0x32d   : > { %696 = vrot.lane.b32.xlu1 %v1297_v13, %s1216_s20 }
 0x334   : > { %833 = vrot.lane.b32.xlu0 %v1297_v13, %s1217_s21 }
 0x36a   : > { %v421_v35 = vpop.xlane.xlu0 %420 }
 0x36b   : > { %1181 = vrcp.f32 %v421_v35 }
 0x36c   : > { %v424_v36 = vpop.xlane.xlu1 %423 }
 0x36d   : > { %1183 = vrcp.f32 %v424_v36 }
 0x370   : > { %v560_v44 = vpop.permute.xlu1 %559 }
 0x371   : > { %v565_v13 = vsel %vm435_vm5, %v560_v44, 0 }
 0x372   : > { %v550_v37 = vpop.xlane.xlu0 %549 }
 0x373   : > { %1185 = vrcp.f32 %v550_v37 }
 0x375   : > { %v1182_v38 = vpop.eup %1181 }
 0x376   : > { %v431_v39 = vpop.permute.xlu0 %430  ;;  %v427_v42 = vmul.f32 %v1182_v38, %v1166_v3 }
 0x377   : > { %v1184_v40 = vpop.eup %1183  ;;  %v437_v41 = vsel %vm435_vm5, %v431_v39, 0 }
 0x378   : > { %v428_v43 = vmul.f32 %v1184_v40, %v1168_v5  ;;  %1088 = vmatpush3.bf16.msra.mxu0 %v437_v41 }
 0x379   : > { %1099 = vmatprep.subr.bf16.mxu0 %v1205_v1 }
 0x37a   : > { %v429_v45 = vpack.c.bf16 %v428_v43, %v427_v42 }
 0x37c   : > { %1090 = vmatmul.mubr.msk.bf16.vlgmr.msra.gmra.mrb[4].mxu0 %vm405_vm3, %v429_v45 }
 0x37d   : > { %1100 = vmatpush3.bf16.msra.mxu0 %v565_v13  ;;  %1101 = vmatprep.mubr.msk.bf16.mxu0 %vm1206_vm0, %v1205_v1  ;;  %v1186_v50 = vpop.eup %1185 }
 0x37e   : > { %1111 = vmatprep.subr.bf16.mxu0 %v1205_v1  ;;  %v556_v53 = vmul.f32 %v1186_v50, %v1337_v7 }
 0x3a1   : > { %v553_v46 = vpop.xlane.xlu1 %552 }
 0x3a2   : > { %1187 = vrcp.f32 %v553_v46 }
 0x3a5   : > { %v690_v47 = vpop.xlane.xlu1 %689 }
 0x3a6   : > { %1189 = vrcp.f32 %v690_v47 }
 0x3a7   : > { %v687_v48 = vpop.xlane.xlu0 %686 }
 0x3a8   : > { %1191 = vrcp.f32 %v687_v48 }
 0x3a9   : > { %v827_v49 = vpop.xlane.xlu1 %826 }
 0x3ab   : > { %v824_v51 = vpop.xlane.xlu0 %823 }
 0x3ac   : > { %v1188_v52 = vpop.eup %1187  ;;  %1193 = vrcp.f32 %v824_v51 }
 0x3ad   : > { %v557_v54 = vmul.f32 %v1188_v52, %v1172_v25  ;;  %v697_v55 = vpop.permute.xlu1 %696  ;;  %1195 = vrcp.f32 %v827_v49 }
 0x3ae   : > { %v702_v58 = vsel %vm435_vm5, %v697_v55, 0 }
 0x3af   : > { %v558_v56 = vpack.c.bf16 %v557_v54, %v556_v53  ;;  %v834_v62 = vpop.permute.xlu0 %833 }
 0x3b0   : > { %v1190_v57 = vpop.eup %1189  ;;  %v839_v2 = vsel %vm435_vm5, %v834_v62, 0 }
 0x3b1   : > { %1102 = vmatmul.mubr.msk.bf16.vlgmr.msra.gmra.mrb[8].mxu0 %vm405_vm3, %v558_v56  ;;  %v694_v61 = vmul.f32 %v1190_v57, %v1344_v27 }
 0x3b2   : > { %v1192_v59 = vpop.eup %1191  ;;  %1112 = vmatpush3.bf16.msra.mxu0 %v702_v58  ;;  %1113 = vmatprep.mubr.msk.bf16.mxu0 %vm1206_vm0, %v1205_v1 }
 0x3b3   : > { %v693_v60 = vmul.f32 %v1192_v59, %v1176_v28  ;;  %1123 = vmatprep.subr.bf16.mxu0 %v1205_v1 }
 0x3b5   : > { %v695_v63 = vpack.c.bf16 %v694_v61, %v693_v60 }
 0x3b6   : > { %v1194_v0 = vpop.eup %1193 }
 0x3b7   : > { %v1196_v3 = vpop.eup %1195  ;;  %v830_v4 = vmul.f32 %v1194_v0, %v1351_v32 }
 0x3b8   : > { %v831_v5 = vmul.f32 %v1196_v3, %v1348_v30 }
 0x3b9   : > { %1114 = vmatmul.mubr.msk.bf16.vlgmr.msra.gmra.mrb[12].mxu0 %vm405_vm3, %v695_v63 }
 0x3ba   : > { %1124 = vmatpush3.bf16.msra.mxu0 %v839_v2  ;;  %1125 = vmatprep.mubr.msk.bf16.mxu0 %vm1206_vm0, %v1205_v1  ;;  %v832_v6 = vpack.c.bf16 %v831_v5, %v830_v4 }
 0x3c1   : > { %1126 = vmatmul.mubr.msk.bf16.vlgmr.msra.gmra.mrb[16].mxu0 %vm405_vm3, %v832_v6 }
 0x44f   : > { %v473_v7 = vpop.f32.mrb[4].mxu0 }
 0x450   : > { %480 = vst.msk [vmem:[#allocation2] sm:$0xff] %vm355_vm2, %v473_v7  ;;  %v1091_v8 = vpop.f32.mrb[5].mxu0 }
 0x451   : > { %v476_v9 = vpop.f32.mrb[6].mxu0 }
 0x452   : > { %482 = vst.msk [vmem:[#allocation2 + $0x8] sm:$0x3] %vm481_vm6, %v476_v9  ;;  %v1092_v10 = vpop.f32.mrb[7].mxu0 }
 0x484   : > { %v601_v11 = vpop.f32.mrb[8].mxu0 }
 0x485   : > { %610 = vrot.lane.b32.xlu1 %v601_v11, %s1218_s22  ;;  %v1103_v12 = vpop.f32.mrb[9].mxu0 }
 0x486   : > { %v604_v14 = vpop.f32.mrb[10].mxu0 }
 0x487   : > { %612 = vrot.lane.b32.xlu0 %v604_v14, %s1218_s22  ;;  %v1104_v15 = vpop.f32.mrb[11].mxu0 }
 0x48c   : > { %v738_v17 = vpop.f32.mrb[12].mxu0 }
 0x48d   : > { %747 = vrot.lane.b32.xlu1 %v738_v17, %s1219_s27  ;;  %v1115_v19 = vpop.f32.mrb[13].mxu0 }
 0x48e   : > { %v741_v20 = vpop.f32.mrb[14].mxu0 }
 0x48f   : > { %749 = vrot.lane.b32.xlu0 %v741_v20, %s1219_s27  ;;  %v1116_v21 = vpop.f32.mrb[15].mxu0 }
 0x494   : > { %v875_v22 = vpop.f32.mrb[16].mxu0 }
 0x495   : > { %884 = vrot.lane.b32.xlu1 %v875_v22, %s1220_s29  ;;  %v1127_v23 = vpop.f32.mrb[17].mxu0 }
 0x496   : > { %v878_v24 = vpop.f32.mrb[18].mxu0 }
 0x497   : > { %886 = vrot.lane.b32.xlu0 %v878_v24, %s1220_s29  ;;  %v1128_v25 = vpop.f32.mrb[19].mxu0 }
 0x4f7   : > { %v611_v26 = vpop.permute.xlu1 %610 }
 0x4f8   : > { %617 = vst.msk [vmem:[#allocation2] sm:$0xff] %vm616_vm7, %v611_v26 }
 0x4f9   : > { %v613_v27 = vpop.permute.xlu0 %612 }
 0x4fa   : > { %619 = vst.msk [vmem:[#allocation2 + $0x8] sm:$0x3] %vm618_vm8, %v613_v27 }
 0x4ff   : > { %v748_v28 = vpop.permute.xlu1 %747 }
 0x500   : > { %754 = vst.msk [vmem:[#allocation2] sm:$0xff] %vm753_vm9, %v748_v28 }
 0x501   : > { %v750_v1 = vpop.permute.xlu0 %749 }
 0x502   : > { %756 = vst.msk [vmem:[#allocation2 + $0x8] sm:$0x3] %vm755_vm10, %v750_v1 }
 0x507   : > { %v885_v29 = vpop.permute.xlu1 %884 }
 0x508   : > { %891 = vst.msk [vmem:[#allocation2] sm:$0xff] %vm890_vm11, %v885_v29 }
 0x509   : > { %v887_v30 = vpop.permute.xlu0 %886 }
 0x50a   : > { %893 = vst.msk [vmem:[#allocation2 + $0x8] sm:$0x3] %vm892_vm12, %v887_v30 }
 0x50f   : > { %v894_v31 = vld [vmem:[#allocation2] sm:$0xff] }
 0x511   : > { %v895_v32 = vld [vmem:[#allocation2 + $0x8] sm:$0x3] }
 0x512   : > { %v896_v33 = vpack.c.bf16 %v895_v32, %v894_v31 }
 0x514   : > { %1134 = vmatmul.mubr.msk.bf16.vlgmr.msra.gmra.mrb[16].mxu1 %vm306_vm1, %v896_v33 }
 0x5e7   : > { %v957_v35 = vpop.f32.mrb[16].mxu1 }
 0x5e8   : > { %v958_v36 = vadd.f32 %v1043_v34, %v957_v35  ;;  %v1135_v37 = vpop.f32.mrb[17].mxu1 }
 0x5e9   : > { %v960_v38 = vpop.f32.mrb[18].mxu1 }
 0x5ea   : > { %964 = vst.msk [vmem:[%s278_s11] sm:$0xff] %vm306_vm1, %v958_v36  ;;  %v961_v39 = vadd.f32 %v1043_v34, %v960_v38  ;;  %v1136_v40 = vpop.f32.mrb[19].mxu1 }
 0x5ec   : > { %966 = vst.msk [vmem:[%s278_s11 + $0x8] sm:$0x3] %vm965_vm13, %v961_v39 }
 0x5ed PF: > { %s17_s24 = sadd.s32 1, %s1203_s24  }
 0x5ee   : > { %p14_p4 = scmp.ge.s32.totalorder %s17_s24, 4  }
 0x5f0   :  { %16 = sbr.rel (!%p14_p4) target bundleno = 1 (0x1), region = 78 }

</bundles_post_ra>
